<compile_context>
chip_gen: v7x
topology: tpu7x:2x2x1
jax: 0.10.0
libtpu: 0.0.40
codegen_flags: <defaults>
</compile_context>

<pallas_src>
import functools

import jax
import jax.numpy as jnp
from jax import lax
from jax.experimental import pallas as pl
from jax.experimental.pallas import tpu as pltpu


# ----------------------------- helpers (glue) ------------------------------ #
def autopad(k, p=None, d=1):
    """Pad to 'same' shape outputs (mirrors the PyTorch helper)."""
    if d > 1:
        k = d * (k - 1) + 1 if isinstance(k, int) else [d * (x - 1) + 1 for x in k]
    if p is None:
        p = k // 2 if isinstance(k, int) else [x // 2 for x in k]
    return p


def _round_up(x, m):
    return (x + m - 1) // m * m


def _apply_act(x, act_name):
    if act_name == 'none':
        return x
    if act_name == 'relu':
        return jnp.maximum(x, 0.0)
    if act_name == 'relu6':
        return jnp.clip(x, 0.0, 6.0)
    if act_name == 'silu':
        return x * jax.nn.sigmoid(x)
    if act_name == 'gelu':
        return jax.nn.gelu(x)
    if act_name == 'hs':  # hardswish
        return x * jnp.clip(x + 3.0, 0.0, 6.0) / 6.0
    raise ValueError(f"unknown act {act_name}")


# ------------------------------ Pallas kernel ------------------------------ #
def _conv_tap_kernel(x_ref, w_ref, b_ref, o_ref, acc_ref, *,
                     k, stride, dilation, th, wo_p, act_name):
    # x_ref:   (TH_in, Wp, Cin)     halo'd input rows for this block
    # w_ref:   (k*k, Cin, Cout_p)   grid-invariant (resident) weights
    # b_ref:   (1, Cout_p) f32      grid-invariant bias
    # o_ref:   (TH*Wo_p, Cout_p)    lane-dense output block
    # acc_ref: (TH*Wo_p, Cout_p)    f32 VMEM scratch accumulator
    cin = x_ref.shape[-1]
    for ky in range(k):            # static unroll: k*k small MXU dots
        for kx in range(k):
            y0 = ky * dilation
            x0 = kx * dilation
            if stride == 1:
                xt = x_ref[pl.ds(y0, th), pl.ds(x0, wo_p), :]
            else:
                xt = x_ref[pl.ds(y0, th, stride), pl.ds(x0, wo_p, stride), :]
            lhs = xt.reshape(th * wo_p, cin)          # Wo_p % 8 == 0 -> layout no-op
            contrib = jnp.dot(lhs, w_ref[ky * k + kx],
                              preferred_element_type=jnp.float32)
            if ky == 0 and kx == 0:
                acc_ref[...] = contrib + b_ref[...]
            else:
                acc_ref[...] += contrib
    o_ref[...] = _apply_act(acc_ref[...], act_name).astype(o_ref.dtype)


# ----------------------------- tile selection ------------------------------ #
def _choose_th(ho, wo_p, wp, cin, cout_p, k, stride, dilation, dtype_bytes,
               target_m=1024, vmem_budget=20 * 1024 * 1024):
    """Pick TH (output rows per grid step) aiming at target_m matmul rows while
    keeping the double-buffered working set under a v7x-safe VMEM budget."""
    def working_set(th):
        th_in = (th - 1) * stride + dilation * (k - 1) + 1
        in_b = th_in * _round_up(wp, 8) * _round_up(cin, 128) * dtype_bytes
        out_b = th * wo_p * cout_p * dtype_bytes
        acc_b = th * wo_p * cout_p * 4
        w_b = k * k * _round_up(cin, 8) * cout_p * dtype_bytes
        return 2 * (in_b + out_b) + acc_b + 2 * w_b

    th = max(1, min(ho, max(1, target_m // max(wo_p, 1))))
    while th > 1 and working_set(th) > vmem_budget:
        th = max(1, th // 2)
    return th, working_set(th)


# ------------------------------- wrappers ----------------------------------- #
def conv_forward_nhwc(x_nhwc, weight_oihw, bias, *, kernel_size, stride=1,
                      padding=None, dilation=1, groups=1,
                      norm_layer='none', act_layer='none',
                      compute_dtype=None, target_m=1024):
    assert stride in (1, 2), 'stride must 1 or 2'
    assert groups == 1      # TODO(synk): grouped / depthwise conv not implemented
    assert norm_layer == 'none'  # TODO(synk): bn/in/ln/gn norm variants not implemented

    k = kernel_size
    d = dilation
    p = autopad(k, padding, d)

    n, h, w, cin = x_nhwc.shape
    cout = weight_oihw.shape[0]
    ho = (h + 2 * p - d * (k - 1) - 1) // stride + 1
    wo = (w + 2 * p - d * (k - 1) - 1) // stride + 1

    # compute_dtype=jnp.bfloat16 recommended on v6e/v7x (f32 accumulation kept).
    cdt = jnp.dtype(compute_dtype) if compute_dtype is not None else jnp.dtype(x_nhwc.dtype)
    out_dtype = x_nhwc.dtype

    cout_p = _round_up(cout, 128)          # lane-dense output / full MXU N
    wo_p = _round_up(wo, 8)                # sublane-aligned row merge

    # Padded spatial extents so every (padded) output position reads in-bounds zeros.
    wp = max(w + 2 * p, d * (k - 1) + (wo_p - 1) * stride + 1)

    th, ws_bytes = _choose_th(ho, wo_p, wp, cin, cout_p, k, stride, d,
                              cdt.itemsize, target_m=target_m)
    rb = -(-ho // th)                      # number of output-row blocks
    th_in = (th - 1) * stride + d * (k - 1) + 1
    hp = max(h + 2 * p, (rb * th - 1) * stride + d * (k - 1) + 1)

    xp = jnp.pad(x_nhwc.astype(cdt),
                 ((0, 0), (p, hp - p - h), (p, wp - p - w), (0, 0)))

    # Overlapping row windows with a (k-1)-row halo: (n*rb, th_in, wp, cin).
    wins = [xp[:, r * th * stride: r * th * stride + th_in] for r in range(rb)]
    xw = jnp.stack(wins, axis=1).reshape(n * rb, th_in, wp, cin)

    # (Cout, Cin, K, K) -> (K, K, Cin, Cout) -> (K*K, Cin, Cout_p), zero-padded.
    wmat = jnp.transpose(weight_oihw, (2, 3, 1, 0)).reshape(k * k, cin, cout)
    wmat = jnp.pad(wmat, ((0, 0), (0, 0), (0, cout_p - cout))).astype(cdt)
    bvec = jnp.pad(bias.astype(jnp.float32), (0, cout_p - cout)).reshape(1, cout_p)

    m_blk = th * wo_p
    grid = (n * rb,)

    flops = 2 * n * rb * m_blk * k * k * cin * cout_p
    bytes_accessed = int(xw.size * cdt.itemsize + wmat.size * cdt.itemsize
                         + n * rb * m_blk * cout_p * jnp.dtype(out_dtype).itemsize)
    vmem_limit = int(min(48 * 1024 * 1024,
                         max(32 * 1024 * 1024, 2 * ws_bytes + 4 * 1024 * 1024)))

    out = pl.pallas_call(
        functools.partial(_conv_tap_kernel, k=k, stride=stride, dilation=d,
                          th=th, wo_p=wo_p, act_name=act_layer),
        out_shape=jax.ShapeDtypeStruct((n * rb, m_blk, cout_p), out_dtype),
        grid_spec=pltpu.PrefetchScalarGridSpec(
            num_scalar_prefetch=0,
            grid=grid,
            in_specs=[
                # halo'd input block (leading dim squeezed)
                pl.BlockSpec((None, th_in, wp, cin), lambda i: (i, 0, 0, 0)),
                # resident weights / bias (constant block index -> fetched once)
                pl.BlockSpec((k * k, cin, cout_p), lambda i: (0, 0, 0)),
                pl.BlockSpec((1, cout_p), lambda i: (0, 0)),
            ],
            out_specs=pl.BlockSpec((None, m_blk, cout_p), lambda i: (i, 0, 0)),
            scratch_shapes=[pltpu.VMEM((m_blk, cout_p), jnp.float32)],
        ),
        compiler_params=pltpu.CompilerParams(
            dimension_semantics=("parallel",),
            vmem_limit_bytes=vmem_limit,
        ),
        cost_estimate=pl.CostEstimate(flops=int(flops), transcendentals=0,
                                      bytes_accessed=bytes_accessed),
    )(xw, wmat, bvec)

    # (n*rb, th*wo_p, cout_p) -> (n, rb*th, wo_p, cout_p) -> crop padding.
    out = out.reshape(n, rb * th, wo_p, cout_p)[:, :ho, :wo, :cout]
    return out


def conv_forward(x_nchw, weight_oihw, bias, **kwargs):
    """PyTorch-layout (NCHW) wrapper.  Prefer conv_forward_nhwc when composing
    layers to avoid the two full-tensor layout round-trips."""
    x_nhwc = jnp.transpose(x_nchw, (0, 2, 3, 1))
    out_nhwc = conv_forward_nhwc(x_nhwc, weight_oihw, bias, **kwargs)
    return jnp.transpose(out_nhwc, (0, 3, 1, 2))


# --------------------------------- main ------------------------------------ #
if __name__ == "__main__":
    # Conv(dim_in=4, dim_out=8, kernel_size=3, stride=1) -> norm='none', act='none'
    N, CIN, COUT, H, W, K, STRIDE = 2, 4, 8, 16, 16, 3, 1

    key = jax.random.PRNGKey(0)
    kx_, kw_, kb_ = jax.random.split(key, 3)

    x = jax.random.normal(kx_, (N, CIN, H, W), dtype=jnp.float32)

    # Deterministic init mimicking nn.Conv2d (uniform in [-1/sqrt(fan_in), +...]).
    fan_in = CIN * K * K
    bound = 1.0 / (fan_in ** 0.5)
    weight = jax.random.uniform(kw_, (COUT, CIN, K, K), jnp.float32, -bound, bound)
    bias = jax.random.uniform(kb_, (COUT,), jnp.float32, -bound, bound)

    conv_fn = jax.jit(functools.partial(conv_forward, kernel_size=K, stride=STRIDE,
                                        norm_layer='none', act_layer='none'))
    y = conv_fn(x, weight, bias)
    y = jax.block_until_ready(y)

    # Cross-check against XLA's conv (same semantics as torch.nn.Conv2d).
    pad = autopad(K, None, 1)
    y_ref = lax.conv_general_dilated(
        x, weight, window_strides=(STRIDE, STRIDE),
        padding=[(pad, pad), (pad, pad)],
        dimension_numbers=('NCHW', 'OIHW', 'NCHW')) + bias.reshape(1, -1, 1, 1)

    assert y.shape == (N, COUT, H // STRIDE, W // STRIDE), y.shape
    assert jnp.allclose(y, y_ref, atol=1e-3, rtol=1e-3), "mismatch vs XLA conv"

    print("KERNEL_OK")
</pallas_src>

<mosaic_0001>
module attributes {stable_mosaic.version = 11 : i64} {
  func.func @_conv_tap_kernel(%arg0: i32, %arg1: memref<1x18x18x4xf32, #tpu.memory_space<vmem>>, %arg2: memref<9x4x128xf32, #tpu.memory_space<vmem>>, %arg3: memref<1x128xf32, #tpu.memory_space<vmem>>, %arg4: memref<1x256x128xf32, #tpu.memory_space<vmem>>, %arg5: memref<256x128xf32, #tpu.memory_space<vmem>>) attributes {dimension_semantics = [#tpu.dimension_semantics<parallel>], iteration_bounds = array<i64: 2>, scalar_prefetch = 0 : i64, scratch_operands = 1 : i64, tpu.core_type = #tpu.core_type<tc>, window_params = [{transform_indices = @transform_0, window_bounds = array<i64: 1, 18, 18, 4>}, {pipeline_mode = #tpu.pipeline_mode<synchronous>, transform_indices = @transform_1, window_bounds = array<i64: 9, 4, 128>}, {pipeline_mode = #tpu.pipeline_mode<synchronous>, transform_indices = @transform_2, window_bounds = array<i64: 1, 128>}, {transform_indices = @transform_3, window_bounds = array<i64: 1, 256, 128>}]} {
    %c0 = arith.constant 0 : index
    %c0_0 = arith.constant 0 : index
    %c0_1 = arith.constant 0 : index
    %c0_2 = arith.constant 0 : index
    %0 = vector.load %arg1[%c0, %c0_0, %c0_1, %c0_2] : memref<1x18x18x4xf32, #tpu.memory_space<vmem>>, vector<1x16x16x4xf32>
    %1 = vector.shape_cast %0 : vector<1x16x16x4xf32> to vector<16x16x4xf32>
    %2 = vector.shape_cast %1 : vector<16x16x4xf32> to vector<256x4xf32>
    %c0_3 = arith.constant 0 : index
    %c0_4 = arith.constant 0 : index
    %c0_5 = arith.constant 0 : index
    %3 = vector.load %arg2[%c0_3, %c0_4, %c0_5] : memref<9x4x128xf32, #tpu.memory_space<vmem>>, vector<1x4x128xf32>
    %4 = vector.shape_cast %3 : vector<1x4x128xf32> to vector<4x128xf32>
    %cst = arith.constant dense<0.000000e+00> : vector<256x128xf32>
    %5 = tpu.matmul %2, %4, %cst {dimension_numbers = #tpu.dot_dimension_numbers<[1], [0], [0], [1], [0, 0, 1, 1], [], []>} : vector<256x4xf32>, vector<4x128xf32>, vector<256x128xf32> -> vector<256x128xf32>
    %c0_6 = arith.constant 0 : index
    %c0_7 = arith.constant 0 : index
    %6 = vector.load %arg3[%c0_6, %c0_7] : memref<1x128xf32, #tpu.memory_space<vmem>>, vector<1x128xf32>
    %7 = vector.broadcast %6 : vector<1x128xf32> to vector<256x128xf32>
    %8 = arith.addf %5, %7 : vector<256x128xf32>
    %c0_8 = arith.constant 0 : index
    %c0_9 = arith.constant 0 : index
    %9 = vector.load %arg5[%c0_8, %c0_9] : memref<256x128xf32, #tpu.memory_space<vmem>>, vector<256x128xf32>
    tpu.vector_store %arg5[%c0_8, %c0_9], %8 {strides = array<i32>} : memref<256x128xf32, #tpu.memory_space<vmem>>, vector<256x128xf32>,
    %c0_10 = arith.constant 0 : index
    %c0_11 = arith.constant 0 : index
    %c1 = arith.constant 1 : index
    %c0_12 = arith.constant 0 : index
    %10 = vector.load %arg1[%c0_10, %c0_11, %c1, %c0_12] : memref<1x18x18x4xf32, #tpu.memory_space<vmem>>, vector<1x16x16x4xf32>
    %11 = vector.shape_cast %10 : vector<1x16x16x4xf32> to vector<16x16x4xf32>
    %12 = vector.shape_cast %11 : vector<16x16x4xf32> to vector<256x4xf32>
    %c1_13 = arith.constant 1 : index
    %c0_14 = arith.constant 0 : index
    %c0_15 = arith.constant 0 : index
    %13 = vector.load %arg2[%c1_13, %c0_14, %c0_15] : memref<9x4x128xf32, #tpu.memory_space<vmem>>, vector<1x4x128xf32>
    %14 = vector.shape_cast %13 : vector<1x4x128xf32> to vector<4x128xf32>
    %cst_16 = arith.constant dense<0.000000e+00> : vector<256x128xf32>
    %15 = tpu.matmul %12, %14, %cst_16 {dimension_numbers = #tpu.dot_dimension_numbers<[1], [0], [0], [1], [0, 0, 1, 1], [], []>} : vector<256x4xf32>, vector<4x128xf32>, vector<256x128xf32> -> vector<256x128xf32>
    %c0_17 = arith.constant 0 : index
    %c0_18 = arith.constant 0 : index
    %16 = vector.load %arg5[%c0_17, %c0_18] : memref<256x128xf32, #tpu.memory_space<vmem>>, vector<256x128xf32>
    %17 = arith.addf %16, %15 : vector<256x128xf32>
    %c0_19 = arith.constant 0 : index
    %c0_20 = arith.constant 0 : index
    %18 = vector.load %arg5[%c0_19, %c0_20] : memref<256x128xf32, #tpu.memory_space<vmem>>, vector<256x128xf32>
    tpu.vector_store %arg5[%c0_19, %c0_20], %17 {strides = array<i32>} : memref<256x128xf32, #tpu.memory_space<vmem>>, vector<256x128xf32>,
    %c0_21 = arith.constant 0 : index
    %c0_22 = arith.constant 0 : index
    %c2 = arith.constant 2 : index
    %c0_23 = arith.constant 0 : index
    %19 = vector.load %arg1[%c0_21, %c0_22, %c2, %c0_23] : memref<1x18x18x4xf32, #tpu.memory_space<vmem>>, vector<1x16x16x4xf32>
    %20 = vector.shape_cast %19 : vector<1x16x16x4xf32> to vector<16x16x4xf32>
    %21 = vector.shape_cast %20 : vector<16x16x4xf32> to vector<256x4xf32>
    %c2_24 = arith.constant 2 : index
    %c0_25 = arith.constant 0 : index
    %c0_26 = arith.constant 0 : index
    %22 = vector.load %arg2[%c2_24, %c0_25, %c0_26] : memref<9x4x128xf32, #tpu.memory_space<vmem>>, vector<1x4x128xf32>
    %23 = vector.shape_cast %22 : vector<1x4x128xf32> to vector<4x128xf32>
    %cst_27 = arith.constant dense<0.000000e+00> : vector<256x128xf32>
    %24 = tpu.matmul %21, %23, %cst_27 {dimension_numbers = #tpu.dot_dimension_numbers<[1], [0], [0], [1], [0, 0, 1, 1], [], []>} : vector<256x4xf32>, vector<4x128xf32>, vector<256x128xf32> -> vector<256x128xf32>
    %c0_28 = arith.constant 0 : index
    %c0_29 = arith.constant 0 : index
    %25 = vector.load %arg5[%c0_28, %c0_29] : memref<256x128xf32, #tpu.memory_space<vmem>>, vector<256x128xf32>
    %26 = arith.addf %25, %24 : vector<256x128xf32>
    %c0_30 = arith.constant 0 : index
    %c0_31 = arith.constant 0 : index
    %27 = vector.load %arg5[%c0_30, %c0_31] : memref<256x128xf32, #tpu.memory_space<vmem>>, vector<256x128xf32>
    tpu.vector_store %arg5[%c0_30, %c0_31], %26 {strides = array<i32>} : memref<256x128xf32, #tpu.memory_space<vmem>>, vector<256x128xf32>,
    %c0_32 = arith.constant 0 : index
    %c1_33 = arith.constant 1 : index
    %c0_34 = arith.constant 0 : index
    %c0_35 = arith.constant 0 : index
    %28 = vector.load %arg1[%c0_32, %c1_33, %c0_34, %c0_35] : memref<1x18x18x4xf32, #tpu.memory_space<vmem>>, vector<1x16x16x4xf32>
    %29 = vector.shape_cast %28 : vector<1x16x16x4xf32> to vector<16x16x4xf32>
    %30 = vector.shape_cast %29 : vector<16x16x4xf32> to vector<256x4xf32>
    %c3 = arith.constant 3 : index
    %c0_36 = arith.constant 0 : index
    %c0_37 = arith.constant 0 : index
    %31 = vector.load %arg2[%c3, %c0_36, %c0_37] : memref<9x4x128xf32, #tpu.memory_space<vmem>>, vector<1x4x128xf32>
    %32 = vector.shape_cast %31 : vector<1x4x128xf32> to vector<4x128xf32>
    %cst_38 = arith.constant dense<0.000000e+00> : vector<256x128xf32>
    %33 = tpu.matmul %30, %32, %cst_38 {dimension_numbers = #tpu.dot_dimension_numbers<[1], [0], [0], [1], [0, 0, 1, 1], [], []>} : vector<256x4xf32>, vector<4x128xf32>, vector<256x128xf32> -> vector<256x128xf32>
    %c0_39 = arith.constant 0 : index
    %c0_40 = arith.constant 0 : index
    %34 = vector.load %arg5[%c0_39, %c0_40] : memref<256x128xf32, #tpu.memory_space<vmem>>, vector<256x128xf32>
    %35 = arith.addf %34, %33 : vector<256x128xf32>
    %c0_41 = arith.constant 0 : index
    %c0_42 = arith.constant 0 : index
    %36 = vector.load %arg5[%c0_41, %c0_42] : memref<256x128xf32, #tpu.memory_space<vmem>>, vector<256x128xf32>
    tpu.vector_store %arg5[%c0_41, %c0_42], %35 {strides = array<i32>} : memref<256x128xf32, #tpu.memory_space<vmem>>, vector<256x128xf32>,
    %c0_43 = arith.constant 0 : index
    %c1_44 = arith.constant 1 : index
    %c1_45 = arith.constant 1 : index
    %c0_46 = arith.constant 0 : index
    %37 = vector.load %arg1[%c0_43, %c1_44, %c1_45, %c0_46] : memref<1x18x18x4xf32, #tpu.memory_space<vmem>>, vector<1x16x16x4xf32>
    %38 = vector.shape_cast %37 : vector<1x16x16x4xf32> to vector<16x16x4xf32>
    %39 = vector.shape_cast %38 : vector<16x16x4xf32> to vector<256x4xf32>
    %c4 = arith.constant 4 : index
    %c0_47 = arith.constant 0 : index
    %c0_48 = arith.constant 0 : index
    %40 = vector.load %arg2[%c4, %c0_47, %c0_48] : memref<9x4x128xf32, #tpu.memory_space<vmem>>, vector<1x4x128xf32>
    %41 = vector.shape_cast %40 : vector<1x4x128xf32> to vector<4x128xf32>
    %cst_49 = arith.constant dense<0.000000e+00> : vector<256x128xf32>
    %42 = tpu.matmul %39, %41, %cst_49 {dimension_numbers = #tpu.dot_dimension_numbers<[1], [0], [0], [1], [0, 0, 1, 1], [], []>} : vector<256x4xf32>, vector<4x128xf32>, vector<256x128xf32> -> vector<256x128xf32>
    %c0_50 = arith.constant 0 : index
    %c0_51 = arith.constant 0 : index
    %43 = vector.load %arg5[%c0_50, %c0_51] : memref<256x128xf32, #tpu.memory_space<vmem>>, vector<256x128xf32>
    %44 = arith.addf %43, %42 : vector<256x128xf32>
    %c0_52 = arith.constant 0 : index
    %c0_53 = arith.constant 0 : index
    %45 = vector.load %arg5[%c0_52, %c0_53] : memref<256x128xf32, #tpu.memory_space<vmem>>, vector<256x128xf32>
    tpu.vector_store %arg5[%c0_52, %c0_53], %44 {strides = array<i32>} : memref<256x128xf32, #tpu.memory_space<vmem>>, vector<256x128xf32>,
    %c0_54 = arith.constant 0 : index
    %c1_55 = arith.constant 1 : index
    %c2_56 = arith.constant 2 : index
    %c0_57 = arith.constant 0 : index
    %46 = vector.load %arg1[%c0_54, %c1_55, %c2_56, %c0_57] : memref<1x18x18x4xf32, #tpu.memory_space<vmem>>, vector<1x16x16x4xf32>
    %47 = vector.shape_cast %46 : vector<1x16x16x4xf32> to vector<16x16x4xf32>
    %48 = vector.shape_cast %47 : vector<16x16x4xf32> to vector<256x4xf32>
    %c5 = arith.constant 5 : index
    %c0_58 = arith.constant 0 : index
    %c0_59 = arith.constant 0 : index
    %49 = vector.load %arg2[%c5, %c0_58, %c0_59] : memref<9x4x128xf32, #tpu.memory_space<vmem>>, vector<1x4x128xf32>
    %50 = vector.shape_cast %49 : vector<1x4x128xf32> to vector<4x128xf32>
    %cst_60 = arith.constant dense<0.000000e+00> : vector<256x128xf32>
    %51 = tpu.matmul %48, %50, %cst_60 {dimension_numbers = #tpu.dot_dimension_numbers<[1], [0], [0], [1], [0, 0, 1, 1], [], []>} : vector<256x4xf32>, vector<4x128xf32>, vector<256x128xf32> -> vector<256x128xf32>
    %c0_61 = arith.constant 0 : index
    %c0_62 = arith.constant 0 : index
    %52 = vector.load %arg5[%c0_61, %c0_62] : memref<256x128xf32, #tpu.memory_space<vmem>>, vector<256x128xf32>
    %53 = arith.addf %52, %51 : vector<256x128xf32>
    %c0_63 = arith.constant 0 : index
    %c0_64 = arith.constant 0 : index
    %54 = vector.load %arg5[%c0_63, %c0_64] : memref<256x128xf32, #tpu.memory_space<vmem>>, vector<256x128xf32>
    tpu.vector_store %arg5[%c0_63, %c0_64], %53 {strides = array<i32>} : memref<256x128xf32, #tpu.memory_space<vmem>>, vector<256x128xf32>,
    %c0_65 = arith.constant 0 : index
    %c2_66 = arith.constant 2 : index
    %c0_67 = arith.constant 0 : index
    %c0_68 = arith.constant 0 : index
    %55 = vector.load %arg1[%c0_65, %c2_66, %c0_67, %c0_68] : memref<1x18x18x4xf32, #tpu.memory_space<vmem>>, vector<1x16x16x4xf32>
    %56 = vector.shape_cast %55 : vector<1x16x16x4xf32> to vector<16x16x4xf32>
    %57 = vector.shape_cast %56 : vector<16x16x4xf32> to vector<256x4xf32>
    %c6 = arith.constant 6 : index
    %c0_69 = arith.constant 0 : index
    %c0_70 = arith.constant 0 : index
    %58 = vector.load %arg2[%c6, %c0_69, %c0_70] : memref<9x4x128xf32, #tpu.memory_space<vmem>>, vector<1x4x128xf32>
    %59 = vector.shape_cast %58 : vector<1x4x128xf32> to vector<4x128xf32>
    %cst_71 = arith.constant dense<0.000000e+00> : vector<256x128xf32>
    %60 = tpu.matmul %57, %59, %cst_71 {dimension_numbers = #tpu.dot_dimension_numbers<[1], [0], [0], [1], [0, 0, 1, 1], [], []>} : vector<256x4xf32>, vector<4x128xf32>, vector<256x128xf32> -> vector<256x128xf32>
    %c0_72 = arith.constant 0 : index
    %c0_73 = arith.constant 0 : index
    %61 = vector.load %arg5[%c0_72, %c0_73] : memref<256x128xf32, #tpu.memory_space<vmem>>, vector<256x128xf32>
    %62 = arith.addf %61, %60 : vector<256x128xf32>
    %c0_74 = arith.constant 0 : index
    %c0_75 = arith.constant 0 : index
    %63 = vector.load %arg5[%c0_74, %c0_75] : memref<256x128xf32, #tpu.memory_space<vmem>>, vector<256x128xf32>
    tpu.vector_store %arg5[%c0_74, %c0_75], %62 {strides = array<i32>} : memref<256x128xf32, #tpu.memory_space<vmem>>, vector<256x128xf32>,
    %c0_76 = arith.constant 0 : index
    %c2_77 = arith.constant 2 : index
    %c1_78 = arith.constant 1 : index
    %c0_79 = arith.constant 0 : index
    %64 = vector.load %arg1[%c0_76, %c2_77, %c1_78, %c0_79] : memref<1x18x18x4xf32, #tpu.memory_space<vmem>>, vector<1x16x16x4xf32>
    %65 = vector.shape_cast %64 : vector<1x16x16x4xf32> to vector<16x16x4xf32>
    %66 = vector.shape_cast %65 : vector<16x16x4xf32> to vector<256x4xf32>
    %c7 = arith.constant 7 : index
    %c0_80 = arith.constant 0 : index
    %c0_81 = arith.constant 0 : index
    %67 = vector.load %arg2[%c7, %c0_80, %c0_81] : memref<9x4x128xf32, #tpu.memory_space<vmem>>, vector<1x4x128xf32>
    %68 = vector.shape_cast %67 : vector<1x4x128xf32> to vector<4x128xf32>
    %cst_82 = arith.constant dense<0.000000e+00> : vector<256x128xf32>
    %69 = tpu.matmul %66, %68, %cst_82 {dimension_numbers = #tpu.dot_dimension_numbers<[1], [0], [0], [1], [0, 0, 1, 1], [], []>} : vector<256x4xf32>, vector<4x128xf32>, vector<256x128xf32> -> vector<256x128xf32>
    %c0_83 = arith.constant 0 : index
    %c0_84 = arith.constant 0 : index
    %70 = vector.load %arg5[%c0_83, %c0_84] : memref<256x128xf32, #tpu.memory_space<vmem>>, vector<256x128xf32>
    %71 = arith.addf %70, %69 : vector<256x128xf32>
    %c0_85 = arith.constant 0 : index
    %c0_86 = arith.constant 0 : index
    %72 = vector.load %arg5[%c0_85, %c0_86] : memref<256x128xf32, #tpu.memory_space<vmem>>, vector<256x128xf32>
    tpu.vector_store %arg5[%c0_85, %c0_86], %71 {strides = array<i32>} : memref<256x128xf32, #tpu.memory_space<vmem>>, vector<256x128xf32>,
    %c0_87 = arith.constant 0 : index
    %c2_88 = arith.constant 2 : index
    %c2_89 = arith.constant 2 : index
    %c0_90 = arith.constant 0 : index
    %73 = vector.load %arg1[%c0_87, %c2_88, %c2_89, %c0_90] : memref<1x18x18x4xf32, #tpu.memory_space<vmem>>, vector<1x16x16x4xf32>
    %74 = vector.shape_cast %73 : vector<1x16x16x4xf32> to vector<16x16x4xf32>
    %75 = vector.shape_cast %74 : vector<16x16x4xf32> to vector<256x4xf32>
    %c8 = arith.constant 8 : index
    %c0_91 = arith.constant 0 : index
    %c0_92 = arith.constant 0 : index
    %76 = vector.load %arg2[%c8, %c0_91, %c0_92] : memref<9x4x128xf32, #tpu.memory_space<vmem>>, vector<1x4x128xf32>
    %77 = vector.shape_cast %76 : vector<1x4x128xf32> to vector<4x128xf32>
    %cst_93 = arith.constant dense<0.000000e+00> : vector<256x128xf32>
    %78 = tpu.matmul %75, %77, %cst_93 {dimension_numbers = #tpu.dot_dimension_numbers<[1], [0], [0], [1], [0, 0, 1, 1], [], []>} : vector<256x4xf32>, vector<4x128xf32>, vector<256x128xf32> -> vector<256x128xf32>
    %c0_94 = arith.constant 0 : index
    %c0_95 = arith.constant 0 : index
    %79 = vector.load %arg5[%c0_94, %c0_95] : memref<256x128xf32, #tpu.memory_space<vmem>>, vector<256x128xf32>
    %80 = arith.addf %79, %78 : vector<256x128xf32>
    %c0_96 = arith.constant 0 : index
    %c0_97 = arith.constant 0 : index
    %81 = vector.load %arg5[%c0_96, %c0_97] : memref<256x128xf32, #tpu.memory_space<vmem>>, vector<256x128xf32>
    tpu.vector_store %arg5[%c0_96, %c0_97], %80 {strides = array<i32>} : memref<256x128xf32, #tpu.memory_space<vmem>>, vector<256x128xf32>,
    %c0_98 = arith.constant 0 : index
    %c0_99 = arith.constant 0 : index
    %82 = vector.load %arg5[%c0_98, %c0_99] : memref<256x128xf32, #tpu.memory_space<vmem>>, vector<256x128xf32>
    %c0_100 = arith.constant 0 : index
    %c0_101 = arith.constant 0 : index
    %c0_102 = arith.constant 0 : index
    %83 = vector.load %arg4[%c0_100, %c0_101, %c0_102] : memref<1x256x128xf32, #tpu.memory_space<vmem>>, vector<1x256x128xf32>
    %84 = vector.shape_cast %83 : vector<1x256x128xf32> to vector<256x128xf32>
    %85 = vector.shape_cast %82 : vector<256x128xf32> to vector<1x256x128xf32>
    tpu.vector_store %arg4[%c0_100, %c0_101, %c0_102], %85 {strides = array<i32>} : memref<1x256x128xf32, #tpu.memory_space<vmem>>, vector<1x256x128xf32>,
    return
  }
  func.func @transform_0(%arg0: i32) -> (i32, i32, i32, i32) {
    %c0_i32 = arith.constant 0 : i32
    %c0_i32_0 = arith.constant 0 : i32
    %c0_i32_1 = arith.constant 0 : i32
    %c0_i32_2 = arith.constant 0 : i32
    return %arg0, %c0_i32, %c0_i32_0, %c0_i32_1 : i32, i32, i32, i32
  }
  func.func @transform_1(%arg0: i32) -> (i32, i32, i32) {
    %c0_i32 = arith.constant 0 : i32
    %c0_i32_0 = arith.constant 0 : i32
    %c0_i32_1 = arith.constant 0 : i32
    %c0_i32_2 = arith.constant 0 : i32
    return %c0_i32, %c0_i32_0, %c0_i32_1 : i32, i32, i32
  }
  func.func @transform_2(%arg0: i32) -> (i32, i32) {
    %c0_i32 = arith.constant 0 : i32
    %c0_i32_0 = arith.constant 0 : i32
    %c0_i32_1 = arith.constant 0 : i32
    return %c0_i32, %c0_i32_0 : i32, i32
  }
  func.func @transform_3(%arg0: i32) -> (i32, i32, i32) {
    %c0_i32 = arith.constant 0 : i32
    %c0_i32_0 = arith.constant 0 : i32
    %c0_i32_1 = arith.constant 0 : i32
    return %arg0, %c0_i32, %c0_i32_0 : i32, i32, i32
  }
}

</mosaic_0001>

<bundles_post_ra>
// kernel: conv_forward.1
= control target key start
LH: loop header
LB: loop body
LE: loop exit
PB: predicated region body
PF: predicated region fallthrough
CT: control target
= control target key end

     0   :  { %s5905_s12 = smov 0   ;;  %s6936_s0 = inlined_call_operand.vmem [shape: f32[2,18,18,4], index: 0, kind: input, shape index: {}]   ;;  %s6937_s1 = inlined_call_operand.vmem [shape: f32[9,4,128], index: 1, kind: input, shape index: {}]   ;;  %s6938_s2 = inlined_call_operand.vmem [shape: f32[1,128], index: 2, kind: input, shape index: {}]   ;;  %s6939_s3 = inlined_call_operand.vmem [shape: f32[2,256,128], index: 3, kind: output, shape index: {}]  }
   0x1 LB: > { %s4322_s13 = sadd.s32 4294967295, %s5883_s12   ;;  %p4326_p0 = scmp.ge.s32.totalorder %s5883_s12, 1  ;;  %s5883_s12 = sphi %s5905_s12, %s13_s12  }
   0x2   : > { %p137_p1 = scmp.lt.s32.totalorder %s5883_s12, 3 }
   0x4   : > { %p138_p2 = pnand %p4326_p0, %p137_p1 }
   0x6   : > { %141 = sbr.rel (%p138_p2) target bundleno = 523 (0x20b), region = 32 }
   0xd   : > { %v203_v0 = vld [vmem:[%s6937_s1] sm:$0xf]  ;;  %vm308_vm0 = vcmask 1043456   ;;  %v5919_v1 = vld [vmem:[%s6937_s1 + $0x10] sm:$0xf]  ;;  %p161_p3 = scmp.lt.s32.totalorder %s4322_s13, 1 }
   0xe   : > { %5128 = vmatprep.subr.msk.mxu1 %vm308_vm0, %v203_v0  ;;  %5328 = vmatprep.subr.msk.mxu0 %vm308_vm0, %v5919_v1  ;;  %v4364_v2 = vld [vmem:[%s6937_s1 + $0x4] sm:$0xf]  ;;  %v4596_v3 = vld [vmem:[%s6937_s1 + $0x14] sm:$0xf]  ;;  %vm211_vm1 = vcmask 31744  }
   0xf   : > { %5129 = vmatpush3.msk.msra.mxu1 %vm308_vm0, %v203_v0  ;;  %s7061_s13 = smov (!%p161_p3, %s4322_s13), 1  ;;  %5329 = vmatpush3.msk.msra.mxu0 %vm308_vm0, %v5919_v1  ;;  %v5966_v10 = vld [vmem:[%s6937_s1 + $0x18] sm:$0xf]  ;;  %v5971_v11 = vld [vmem:[%s6937_s1 + $0x8] sm:$0xf] }
  0x10   : > { %5178 = vmatprep.subr.msk.mxu1 %vm308_vm0, %v4364_v2  ;;  %5378 = vmatprep.subr.msk.mxu0 %vm308_vm0, %v4596_v3  ;;  %s5868_s22 = smul.u32 432, %s7061_s13  ;;  %v6138_v44 = vld [vmem:[%s6937_s1 + $0x1c] sm:$0xf]  ;;  %s4830_s11 = sshll.u32 %s7061_s13, 8 }
  0x11   : > { %s6869_s16 = scalar_lea.vmem %s6939_s3, %s4830_s11 }
  0x12   : > { %s5941_s25 = scalar_lea.vmem %s6936_s0, %s5868_s22 }
  0x13   : > { %v171_v4 = vld [vmem:[%s5941_s25] sm:$0xff]  ;;  %v172_v6 = vld [vmem:[%s5941_s25 + $0x8] sm:$0xff]  ;;  %v5955_v8 = vld [vmem:[%s5941_s25 + $0x18] sm:$0xff] }
  0x14   : > { %v5945_v5 = vld [vmem:[%s5941_s25 + $0x19] sm:$0xff]  ;;  %5130 = vmatprep.mubr.msk.f32.mxu1 %vm211_vm1, %v171_v4  ;;  %v5952_v7 = vld [vmem:[%s5941_s25 + $0x21] sm:$0xff]  ;;  %6990 = vst [vmem:[#allocation3_spill] sm:$0xff] %v5955_v8  ;;  %v5958_v9 = vld [vmem:[%s5941_s25 + $0x31] sm:$0xff] }
  0x15   : > { %5330 = vmatprep.mubr.msk.f32.mxu0 %vm211_vm1, %v5945_v5  ;;  %5131 = vmatmul.mubr.msk.f32.vlgmr.msra.gmra.mrb[0].mxu1 %vm211_vm1, %v172_v6  ;;  %v5976_v12 = vld [vmem:[%s5941_s25 + $0x20] sm:$0xff]  ;;  %v5986_v14 = vld [vmem:[%s5941_s25 + $0x30] sm:$0xff]  ;;  %v6004_v16 = vld [vmem:[%s5941_s25 + $0x38] sm:$0xff] }
  0x16   : > { %5331 = vmatmul.mubr.msk.f32.vlgmr.msra.gmra.mrb[0].mxu0 %vm211_vm1, %v5952_v7  ;;  %5179 = vmatpush3.msk.msra.mxu1 %vm308_vm0, %v4364_v2  ;;  %6991 = vst [vmem:[#allocation4_spill] sm:$0xff] %v5976_v12  ;;  %v5979_v13 = vld [vmem:[%s5941_s25 + $0x39] sm:$0xff]  ;;  %6992 = vst [vmem:[#allocation5_spill] sm:$0xff] %v5986_v14  ;;  %v5989_v15 = vld [vmem:[%s5941_s25 + $0x49] sm:$0xff] }
  0x17   : > { %5379 = vmatpush3.msk.msra.mxu0 %vm308_vm0, %v4596_v3  ;;  %5133 = vmatprep.mubr.msk.f32.mxu1 %vm211_vm1, %v5955_v8  ;;  %v6007_v17 = vld [vmem:[%s5941_s25 + $0x51] sm:$0xff]  ;;  %v6010_v18 = vld [vmem:[%s5941_s25 + $0x48] sm:$0xff]  ;;  %v6030_v22 = vld [vmem:[%s5941_s25 + $0x60] sm:$0xff] }
  0x18   : > { %5333 = vmatprep.mubr.msk.f32.mxu0 %vm211_vm1, %v5958_v9  ;;  %5428 = vmatprep.subr.msk.mxu0 %vm308_vm0, %v5966_v10  ;;  %6993 = vst [vmem:[#allocation6_spill] sm:$0xff] %v6010_v18  ;;  %v6013_v19 = vld [vmem:[%s5941_s25 + $0x61] sm:$0xff]  ;;  %v6024_v20 = vld [vmem:[%s5941_s25 + $0x50] sm:$0xff]  ;;  %6995 = vst [vmem:[#allocation8_spill] sm:$0xff] %v6030_v22 }
  0x19   : > { %5228 = vmatprep.subr.msk.mxu1 %vm308_vm0, %v5971_v11  ;;  %5134 = vmatmul.mubr.msk.f32.gmra.mrb[2].mxu1 %vm211_vm1, %v5976_v12  ;;  %6994 = vst [vmem:[#allocation7_spill] sm:$0xff] %v6024_v20  ;;  %v6027_v21 = vld [vmem:[%s5941_s25 + $0x69] sm:$0xff]  ;;  %v6033_v23 = vld [vmem:[%s5941_s25 + $0x79] sm:$0xff]  ;;  %v6047_v25 = vld [vmem:[%s5941_s25 + $0x81] sm:$0xff] }
  0x1a   : > { %5334 = vmatmul.mubr.msk.f32.gmra.mrb[2].mxu0 %vm211_vm1, %v5979_v13  ;;  %5136 = vmatprep.mubr.msk.f32.mxu1 %vm211_vm1, %v5986_v14  ;;  %v6044_v24 = vld [vmem:[%s5941_s25 + $0x68] sm:$0xff]  ;;  %v6050_v26 = vld [vmem:[%s5941_s25 + $0x78] sm:$0xff]  ;;  %v6064_v28 = vld [vmem:[%s5941_s25 + $0x80] sm:$0xff] }
  0x1b   : > { %5336 = vmatprep.mubr.msk.f32.mxu0 %vm211_vm1, %v5989_v15  ;;  %6996 = vst [vmem:[#allocation9_spill] sm:$0xff] %v6044_v24  ;;  %6997 = vst [vmem:[#allocation10_spill] sm:$0xff] %v6050_v26  ;;  %v6053_v27 = vld [vmem:[%s5941_s25 + $0x91] sm:$0xff]  ;;  %v6067_v29 = vld [vmem:[%s5941_s25 + $0x99] sm:$0xff] }
  0x1c   : > { %6998 = vst [vmem:[#allocation11_spill] sm:$0xff] %v6064_v28  ;;  %v6070_v30 = vld [vmem:[%s5941_s25 + $0x90] sm:$0xff]  ;;  %v6084_v32 = vld [vmem:[%s5941_s25 + $0x98] sm:$0xff]  ;;  %v6090_v34 = vld [vmem:[%s5941_s25 + $0xa8] sm:$0xff] }
  0x1d   : > { %5137 = vmatmul.mubr.msk.f32.gmra.mrb[4].mxu1 %vm211_vm1, %v6004_v16  ;;  %6999 = vst [vmem:[#allocation12_spill] sm:$0xff] %v6070_v30  ;;  %v6073_v31 = vld [vmem:[%s5941_s25 + $0xa9] sm:$0xff]  ;;  %7000 = vst [vmem:[#allocation13_spill] sm:$0xff] %v6084_v32  ;;  %v6087_v33 = vld [vmem:[%s5941_s25 + $0xb1] sm:$0xff] }
  0x1e   : > { %5337 = vmatmul.mubr.msk.f32.gmra.mrb[4].mxu0 %vm211_vm1, %v6007_v17  ;;  %5139 = vmatprep.mubr.msk.f32.mxu1 %vm211_vm1, %v6010_v18  ;;  %7001 = vst [vmem:[#allocation14_spill] sm:$0xff] %v6090_v34  ;;  %v6093_v35 = vld [vmem:[%s5941_s25 + $0xc1] sm:$0xff]  ;;  %v6104_v36 = vld [vmem:[%s5941_s25 + $0xb0] sm:$0xff]  ;;  %v6130_v42 = vld [vmem:[%s5941_s25 + $0xd8] sm:$0xff] }
  0x1f   : > { %5339 = vmatprep.mubr.msk.f32.mxu0 %vm211_vm1, %v6013_v19  ;;  %7002 = vst [vmem:[#allocation15_spill] sm:$0xff] %v6104_v36  ;;  %v6107_v37 = vld [vmem:[%s5941_s25 + $0xc9] sm:$0xff]  ;;  %v6110_v38 = vld [vmem:[%s5941_s25 + $0xc0] sm:$0xff]  ;;  %v6133_v43 = vld [vmem:[%s5941_s25 + $0x32] sm:$0xff] }
  0x20   : > { %v6113_v39 = vld [vmem:[%s5941_s25 + $0x1a] sm:$0xff]  ;;  %v6124_v40 = vld [vmem:[%s5941_s25 + $0xc8] sm:$0xff]  ;;  %v6157_v47 = vld [vmem:[%s5941_s25 + $0xf0] sm:$0xff] }
  0x21   : > { %5140 = vmatmul.mubr.msk.f32.gmra.mrb[6].mxu1 %vm211_vm1, %v6024_v20  ;;  %7003 = vst [vmem:[#allocation16_spill] sm:$0xff] %v6124_v40  ;;  %v6127_v41 = vld [vmem:[%s5941_s25 + $0x22] sm:$0xff]  ;;  %v6152_v46 = vld [vmem:[%s5941_s25 + $0x3a] sm:$0xff]  ;;  %v6160_v48 = vld [vmem:[%s5941_s25 + $0x4a] sm:$0xff] }
  0x22   : > { %5340 = vmatmul.mubr.msk.f32.gmra.mrb[6].mxu0 %vm211_vm1, %v6027_v21  ;;  %5142 = vmatprep.mubr.msk.f32.mxu1 %vm211_vm1, %v6030_v22  ;;  %v6149_v45 = vld [vmem:[%s5941_s25 + $0xe0] sm:$0xff]  ;;  %v6173_v49 = vld [vmem:[%s5941_s25 + $0xf8] sm:$0xff]  ;;  %v6179_v51 = vld [vmem:[%s5941_s25 + $0x108] sm:$0xff] }
  0x23   : > { %5342 = vmatprep.mubr.msk.f32.mxu0 %vm211_vm1, %v6033_v23  ;;  %v6176_v50 = vld [vmem:[%s5941_s25 + $0x52] sm:$0xff]  ;;  %v6182_v52 = vld [vmem:[%s5941_s25 + $0x62] sm:$0xff]  ;;  %v6196_v54 = vld [vmem:[%s5941_s25 + $0x6a] sm:$0xff] }
  0x24   : > { %v6193_v53 = vld [vmem:[%s5941_s25 + $0x110] sm:$0xff]  ;;  %v6199_v55 = vld [vmem:[%s5941_s25 + $0x120] sm:$0xff]  ;;  %v6213_v57 = vld [vmem:[%s5941_s25 + $0x128] sm:$0xff] }
  0x25   : > { %5143 = vmatmul.mubr.msk.f32.gmra.mrb[8].mxu1 %vm211_vm1, %v6044_v24  ;;  %v6202_v56 = vld [vmem:[%s5941_s25 + $0x7a] sm:$0xff]  ;;  %v6216_v58 = vld [vmem:[%s5941_s25 + $0x82] sm:$0xff]  ;;  %v6222_v60 = vld [vmem:[%s5941_s25 + $0x92] sm:$0xff] }
  0x26   : > { %5343 = vmatmul.mubr.msk.f32.gmra.mrb[8].mxu0 %vm211_vm1, %v6047_v25  ;;  %5145 = vmatprep.mubr.msk.f32.mxu1 %vm211_vm1, %v6050_v26  ;;  %v6219_v59 = vld [vmem:[%s5941_s25 + $0x138] sm:$0xff]  ;;  %7004 = vst [vmem:[#allocation17_spill] sm:$0xff] %v6222_v60  ;;  %v6233_v61 = vld [vmem:[%s5941_s25 + $0x140] sm:$0xff]  ;;  %v6239_v63 = vld [vmem:[%s5941_s25 + $0x150] sm:$0xff] }
  0x27   : > { %5345 = vmatprep.mubr.msk.f32.mxu0 %vm211_vm1, %v6053_v27  ;;  %v6236_v62 = vld [vmem:[%s5941_s25 + $0x9a] sm:$0xff]  ;;  %v6242_v0 = vld [vmem:[%s5941_s25 + $0xaa] sm:$0xff]  ;;  %v6256_v3 = vld [vmem:[%s5941_s25 + $0xb2] sm:$0xff] }
  0x28   : > { %7005 = vst [vmem:[#allocation18_spill] sm:$0xff] %v6236_v62  ;;  %7006 = vst [vmem:[#allocation19_spill] sm:$0xff] %v6242_v0  ;;  %v6253_v2 = vld [vmem:[%s5941_s25 + $0x158] sm:$0xff]  ;;  %v6259_v4 = vld [vmem:[%s5941_s25 + $0x168] sm:$0xff] }
  0x29   : > { %5146 = vmatmul.mubr.msk.f32.gmra.mrb[10].mxu1 %vm211_vm1, %v6064_v28  ;;  %7007 = vst [vmem:[#allocation20_spill] sm:$0xff] %v6253_v2  ;;  %7008 = vst [vmem:[#allocation21_spill] sm:$0xff] %v6256_v3  ;;  %v6262_v6 = vld [vmem:[%s5941_s25 + $0xc2] sm:$0xff]  ;;  %v6276_v12 = vld [vmem:[%s5941_s25 + $0xca] sm:$0xff] }
  0x2a   : > { %5346 = vmatmul.mubr.msk.f32.gmra.mrb[10].mxu0 %vm211_vm1, %v6067_v29  ;;  %5148 = vmatprep.mubr.msk.f32.mxu1 %vm211_vm1, %v6070_v30  ;;  %7009 = vst [vmem:[#allocation22_spill] sm:$0xff] %v6259_v4  ;;  %7010 = vst [vmem:[#allocation23_spill] sm:$0xff] %v6262_v6  ;;  %v569_v8 = vld [vmem:[%s5941_s25 + $0x1] sm:$0xff] }
  0x2b   : > { %5348 = vmatprep.mubr.msk.f32.mxu0 %vm211_vm1, %v6073_v31 }
  0x2d   : > { %5149 = vmatmul.mubr.msk.f32.gmra.mrb[12].mxu1 %vm211_vm1, %v6084_v32 }
  0x2e   : > { %5349 = vmatmul.mubr.msk.f32.gmra.mrb[12].mxu0 %vm211_vm1, %v6087_v33  ;;  %5151 = vmatprep.mubr.msk.f32.mxu1 %vm211_vm1, %v6090_v34 }
  0x2f   : > { %5351 = vmatprep.mubr.msk.f32.mxu0 %vm211_vm1, %v6093_v35 }
  0x31   : > { %5152 = vmatmul.mubr.msk.f32.gmra.mrb[14].mxu1 %vm211_vm1, %v6104_v36 }
  0x32   : > { %5352 = vmatmul.mubr.msk.f32.gmra.mrb[14].mxu0 %vm211_vm1, %v6107_v37  ;;  %5154 = vmatprep.mubr.msk.f32.mxu1 %vm211_vm1, %v6110_v38 }
  0x33   : > { %5380 = vmatprep.mubr.msk.f32.mxu0 %vm211_vm1, %v6113_v39 }
  0x35   : > { %5155 = vmatmul.mubr.msk.f32.gmra.mrb[16].mxu1 %vm211_vm1, %v6124_v40 }
  0x36   : > { %5381 = vmatmul.mubr.msk.f32.vlgmr.msra.gmra.mrb[0].mxu0 %vm211_vm1, %v6127_v41  ;;  %5157 = vmatprep.mubr.msk.f32.mxu1 %vm211_vm1, %v6130_v42 }
  0x37   : > { %5429 = vmatpush3.msk.msra.mxu0 %vm308_vm0, %v5966_v10  ;;  %5383 = vmatprep.mubr.msk.f32.mxu0 %vm211_vm1, %v6133_v43  ;;  %v6273_v10 = vld [vmem:[%s5941_s25 + $0x170] sm:$0xff] }
  0x38   : > { %5478 = vmatprep.subr.msk.mxu0 %vm308_vm0, %v6138_v44  ;;  %7011 = vst [vmem:[#allocation24_spill] sm:$0xff] %v6273_v10 }
  0x39   : > { %5158 = vmatmul.mubr.msk.f32.gmra.mrb[18].mxu1 %vm211_vm1, %v6149_v45 }
  0x3a   : > { %5384 = vmatmul.mubr.msk.f32.gmra.mrb[2].mxu0 %vm211_vm1, %v6152_v46  ;;  %5160 = vmatprep.mubr.msk.f32.mxu1 %vm211_vm1, %v6157_v47 }
  0x3b   : > { %5386 = vmatprep.mubr.msk.f32.mxu0 %vm211_vm1, %v6160_v48 }
  0x3d   : > { %5161 = vmatmul.mubr.msk.f32.gmra.mrb[20].mxu1 %vm211_vm1, %v6173_v49 }
  0x3e   : > { %5387 = vmatmul.mubr.msk.f32.gmra.mrb[4].mxu0 %vm211_vm1, %v6176_v50  ;;  %5163 = vmatprep.mubr.msk.f32.mxu1 %vm211_vm1, %v6179_v51 }
  0x3f   : > { %5389 = vmatprep.mubr.msk.f32.mxu0 %vm211_vm1, %v6182_v52 }
  0x41   : > { %5164 = vmatmul.mubr.msk.f32.gmra.mrb[22].mxu1 %vm211_vm1, %v6193_v53 }
  0x42   : > { %5390 = vmatmul.mubr.msk.f32.gmra.mrb[6].mxu0 %vm211_vm1, %v6196_v54  ;;  %5166 = vmatprep.mubr.msk.f32.mxu1 %vm211_vm1, %v6199_v55 }
  0x43   : > { %5392 = vmatprep.mubr.msk.f32.mxu0 %vm211_vm1, %v6202_v56 }
  0x45   : > { %5167 = vmatmul.mubr.msk.f32.gmra.mrb[24].mxu1 %vm211_vm1, %v6213_v57 }
  0x46   : > { %5393 = vmatmul.mubr.msk.f32.gmra.mrb[8].mxu0 %vm211_vm1, %v6216_v58  ;;  %5169 = vmatprep.mubr.msk.f32.mxu1 %vm211_vm1, %v6219_v59 }
  0x47   : > { %5395 = vmatprep.mubr.msk.f32.mxu0 %vm211_vm1, %v6222_v60  ;;  %v6299_v60 = vld [vmem:[%s6937_s1 + $0xc] sm:$0xf] }
  0x49   : > { %5170 = vmatmul.mubr.msk.f32.gmra.mrb[26].mxu1 %vm211_vm1, %v6233_v61 }
  0x4a   : > { %5396 = vmatmul.mubr.msk.f32.gmra.mrb[10].mxu0 %vm211_vm1, %v6236_v62  ;;  %5172 = vmatprep.mubr.msk.f32.mxu1 %vm211_vm1, %v6239_v63  ;;  %v6294_v62 = vld [vmem:[%s5941_s25 + $0xf2] sm:$0xff] }
  0x4b   : > { %5398 = vmatprep.mubr.msk.f32.mxu0 %vm211_vm1, %v6242_v0  ;;  %v6280_v0 = vld [vmem:[%s5941_s25 + $0xda] sm:$0xff] }
  0x4c   : > { %7012 = vst [vmem:[#allocation25_spill] sm:$0xff] %v6280_v0 }
  0x4d   : > { %5173 = vmatmul.mubr.msk.f32.gmra.mrb[28].mxu1 %vm211_vm1, %v6253_v2 }
  0x4e   : > { %5399 = vmatmul.mubr.msk.f32.gmra.mrb[12].mxu0 %vm211_vm1, %v6256_v3  ;;  %5175 = vmatprep.mubr.msk.f32.mxu1 %vm211_vm1, %v6259_v4  ;;  %v6291_v3 = vld [vmem:[%s5941_s25 + $0xe2] sm:$0xff] }
  0x4f   : > { %5401 = vmatprep.mubr.msk.f32.mxu0 %vm211_vm1, %v6262_v6  ;;  %v570_v6 = vld [vmem:[%s5941_s25 + $0x9] sm:$0xff] }
  0x51   : > { %5176 = vmatmul.mubr.msk.f32.gmra.mrb[30].mxu1 %vm211_vm1, %v6273_v10 }
  0x52   : > { %5402 = vmatmul.mubr.msk.f32.gmra.mrb[14].mxu0 %vm211_vm1, %v6276_v12  ;;  %5180 = vmatprep.mubr.msk.f32.mxu1 %vm211_vm1, %v569_v8  ;;  %v6309_v8 = vld [vmem:[%s5941_s25 + $0xfa] sm:$0xff] }
  0x53   : > { %5404 = vmatprep.mubr.msk.f32.mxu0 %vm211_vm1, %v6280_v0  ;;  %v6314_v0 = vld [vmem:[%s5941_s25 + $0x10a] sm:$0xff] }
  0x55   : > { %5181 = vmatmul.mubr.msk.f32.vlgmr.msra.gmra.mrb[0].mxu1 %vm211_vm1, %v570_v6  ;;  %v6344_v6 = vld [vmem:[%s5941_s25 + $0x13a] sm:$0xff] }
  0x56   : > { %5405 = vmatmul.mubr.msk.f32.gmra.mrb[16].mxu0 %vm211_vm1, %v6291_v3  ;;  %5229 = vmatpush3.msk.msra.mxu1 %vm308_vm0, %v5971_v11  ;;  %v6330_v11 = vld [vmem:[%s5941_s25 + $0x122] sm:$0xff]  ;;  %7016 = vst [vmem:[#allocation29_spill] sm:$0xff] %v6344_v6 }
  0x57   : > { %5183 = vmatprep.mubr.msk.f32.mxu1 %vm211_vm1, %v5945_v5  ;;  %5407 = vmatprep.mubr.msk.f32.mxu0 %vm211_vm1, %v6294_v62  ;;  %v6327_v5 = vld [vmem:[%s5941_s25 + $0x112] sm:$0xff]  ;;  %7014 = vst [vmem:[#allocation27_spill] sm:$0xff] %v6330_v11 }
  0x58   : > { %5278 = vmatprep.subr.msk.mxu1 %vm308_vm0, %v6299_v60  ;;  %7013 = vst [vmem:[#allocation26_spill] sm:$0xff] %v6327_v5 }
  0x59   : > { %5184 = vmatmul.mubr.msk.f32.gmra.mrb[2].mxu1 %vm211_vm1, %v5952_v7  ;;  %v6341_v7 = vld [vmem:[%s5941_s25 + $0x12a] sm:$0xff] }
  0x5a   : > { %5408 = vmatmul.mubr.msk.f32.gmra.mrb[18].mxu0 %vm211_vm1, %v6309_v8  ;;  %5186 = vmatprep.mubr.msk.f32.mxu1 %vm211_vm1, %v5958_v9  ;;  %7015 = vst [vmem:[#allocation28_spill] sm:$0xff] %v6341_v7 }
  0x5b   : > { %5410 = vmatprep.mubr.msk.f32.mxu0 %vm211_vm1, %v6314_v0 }
  0x5d   : > { %5187 = vmatmul.mubr.msk.f32.gmra.mrb[4].mxu1 %vm211_vm1, %v5979_v13 }
  0x5e   : > { %5411 = vmatmul.mubr.msk.f32.gmra.mrb[20].mxu0 %vm211_vm1, %v6327_v5  ;;  %5189 = vmatprep.mubr.msk.f32.mxu1 %vm211_vm1, %v5989_v15  ;;  %v6355_v5 = vld [vmem:[%s5941_s25 + $0x142] sm:$0xff] }
  0x5f   : > { %5413 = vmatprep.mubr.msk.f32.mxu0 %vm211_vm1, %v6330_v11  ;;  %7017 = vst [vmem:[#allocation30_spill] sm:$0xff] %v6355_v5  ;;  %v6358_v11 = vld [vmem:[%s5941_s25 + $0x152] sm:$0xff] }
  0x60   : > { %7018 = vst [vmem:[#allocation31_spill] sm:$0xff] %v6358_v11 }
  0x61   : > { %5190 = vmatmul.mubr.msk.f32.gmra.mrb[6].mxu1 %vm211_vm1, %v6007_v17 }
  0x62   : > { %5414 = vmatmul.mubr.msk.f32.gmra.mrb[22].mxu0 %vm211_vm1, %v6341_v7  ;;  %5192 = vmatprep.mubr.msk.f32.mxu1 %vm211_vm1, %v6013_v19  ;;  %v6369_v7 = vld [vmem:[%s5941_s25 + $0x15a] sm:$0xff] }
  0x63   : > { %5416 = vmatprep.mubr.msk.f32.mxu0 %vm211_vm1, %v6344_v6  ;;  %7019 = vst [vmem:[#allocation32_spill] sm:$0xff] %v6369_v7  ;;  %v6372_v6 = vld [vmem:[%s5941_s25 + $0x16a] sm:$0xff] }
  0x65   : > { %5193 = vmatmul.mubr.msk.f32.gmra.mrb[8].mxu1 %vm211_vm1, %v6027_v21 }
  0x66   : > { %5417 = vmatmul.mubr.msk.f32.gmra.mrb[24].mxu0 %vm211_vm1, %v6355_v5  ;;  %5195 = vmatprep.mubr.msk.f32.mxu1 %vm211_vm1, %v6033_v23  ;;  %v6383_v5 = vld [vmem:[%s5941_s25 + $0x172] sm:$0xff] }
  0x67   : > { %5419 = vmatprep.mubr.msk.f32.mxu0 %vm211_vm1, %v6358_v11  ;;  %7020 = vst [vmem:[#allocation33_spill] sm:$0xff] %v6383_v5  ;;  %v6386_v11 = vld [vmem:[%s5941_s25 + $0x182] sm:$0xff] }
  0x68   : > { %7021 = vst [vmem:[#allocation34_spill] sm:$0xff] %v6386_v11 }
  0x69   : > { %5196 = vmatmul.mubr.msk.f32.gmra.mrb[10].mxu1 %vm211_vm1, %v6047_v25 }
  0x6a   : > { %5420 = vmatmul.mubr.msk.f32.gmra.mrb[26].mxu0 %vm211_vm1, %v6369_v7  ;;  %5198 = vmatprep.mubr.msk.f32.mxu1 %vm211_vm1, %v6053_v27  ;;  %v6397_v7 = vld [vmem:[%s5941_s25 + $0x18a] sm:$0xff] }
  0x6b   : > { %5422 = vmatprep.mubr.msk.f32.mxu0 %vm211_vm1, %v6372_v6  ;;  %7022 = vst [vmem:[#allocation35_spill] sm:$0xff] %v6397_v7 }
  0x6d   : > { %5199 = vmatmul.mubr.msk.f32.gmra.mrb[12].mxu1 %vm211_vm1, %v6067_v29 }
  0x6e   : > { %5423 = vmatmul.mubr.msk.f32.gmra.mrb[28].mxu0 %vm211_vm1, %v6383_v5  ;;  %5201 = vmatprep.mubr.msk.f32.mxu1 %vm211_vm1, %v6073_v31  ;;  %v6408_v5 = vld [vmem:[%s5941_s25 + $0xd9] sm:$0xff] }
  0x6f   : > { %5425 = vmatprep.mubr.msk.f32.mxu0 %vm211_vm1, %v6386_v11  ;;  %v6413_v11 = vld [vmem:[%s6937_s1 + $0x20] sm:$0xf] }
  0x71   : > { %5202 = vmatmul.mubr.msk.f32.gmra.mrb[14].mxu1 %vm211_vm1, %v6087_v33 }
  0x72   : > { %5426 = vmatmul.mubr.msk.f32.gmra.mrb[30].mxu0 %vm211_vm1, %v6397_v7  ;;  %5204 = vmatprep.mubr.msk.f32.mxu1 %vm211_vm1, %v6093_v35  ;;  %v6424_v7 = vld [vmem:[%s5941_s25 + $0xe1] sm:$0xff] }
  0x73   : > { %5430 = vmatprep.mubr.msk.f32.mxu0 %vm211_vm1, %v5986_v14  ;;  %v6429_v14 = vld [vmem:[%s5941_s25 + $0xf1] sm:$0xff] }
  0x75   : > { %5205 = vmatmul.mubr.msk.f32.gmra.mrb[16].mxu1 %vm211_vm1, %v6107_v37 }
  0x76   : > { %5431 = vmatmul.mubr.msk.f32.vlgmr.msra.gmra.mrb[0].mxu0 %vm211_vm1, %v6004_v16  ;;  %5207 = vmatprep.mubr.msk.f32.mxu1 %vm211_vm1, %v6408_v5 }
  0x77   : > { %5479 = vmatpush3.msk.msra.mxu0 %vm308_vm0, %v6138_v44  ;;  %5433 = vmatprep.mubr.msk.f32.mxu0 %vm211_vm1, %v6010_v18  ;;  %v6442_v44 = vld [vmem:[%s5941_s25 + $0xf9] sm:$0xff]  ;;  %v6445_v18 = vld [vmem:[%s5941_s25 + $0x109] sm:$0xff] }
  0x78   : > { %5528 = vmatprep.subr.msk.mxu0 %vm308_vm0, %v6413_v11 }
  0x79   : > { %5208 = vmatmul.mubr.msk.f32.gmra.mrb[18].mxu1 %vm211_vm1, %v6424_v7 }
  0x7a   : > { %5434 = vmatmul.mubr.msk.f32.gmra.mrb[2].mxu0 %vm211_vm1, %v6024_v20  ;;  %5210 = vmatprep.mubr.msk.f32.mxu1 %vm211_vm1, %v6429_v14  ;;  %v6456_v20 = vld [vmem:[%s5941_s25 + $0x111] sm:$0xff] }
  0x7b   : > { %5436 = vmatprep.mubr.msk.f32.mxu0 %vm211_vm1, %v6030_v22  ;;  %v6459_v22 = vld [vmem:[%s5941_s25 + $0x121] sm:$0xff] }
  0x7d   : > { %5211 = vmatmul.mubr.msk.f32.gmra.mrb[20].mxu1 %vm211_vm1, %v6442_v44 }
  0x7e   : > { %5437 = vmatmul.mubr.msk.f32.gmra.mrb[4].mxu0 %vm211_vm1, %v6044_v24  ;;  %5213 = vmatprep.mubr.msk.f32.mxu1 %vm211_vm1, %v6445_v18  ;;  %v6470_v24 = vld [vmem:[%s5941_s25 + $0x129] sm:$0xff] }
  0x7f   : > { %5439 = vmatprep.mubr.msk.f32.mxu0 %vm211_vm1, %v6050_v26  ;;  %v6473_v26 = vld [vmem:[%s5941_s25 + $0x139] sm:$0xff] }
  0x81   : > { %5214 = vmatmul.mubr.msk.f32.gmra.mrb[22].mxu1 %vm211_vm1, %v6456_v20 }
  0x82   : > { %5440 = vmatmul.mubr.msk.f32.gmra.mrb[6].mxu0 %vm211_vm1, %v6064_v28  ;;  %5216 = vmatprep.mubr.msk.f32.mxu1 %vm211_vm1, %v6459_v22  ;;  %v6484_v28 = vld [vmem:[%s5941_s25 + $0x141] sm:$0xff] }
  0x83   : > { %5442 = vmatprep.mubr.msk.f32.mxu0 %vm211_vm1, %v6070_v30  ;;  %v6487_v30 = vld [vmem:[%s5941_s25 + $0x151] sm:$0xff] }
  0x84   : > { %7023 = vst [vmem:[#allocation36_spill] sm:$0xff] %v6487_v30 }
  0x85   : > { %5217 = vmatmul.mubr.msk.f32.gmra.mrb[24].mxu1 %vm211_vm1, %v6470_v24 }
  0x86   : > { %5443 = vmatmul.mubr.msk.f32.gmra.mrb[8].mxu0 %vm211_vm1, %v6084_v32  ;;  %5219 = vmatprep.mubr.msk.f32.mxu1 %vm211_vm1, %v6473_v26  ;;  %v6498_v32 = vld [vmem:[%s5941_s25 + $0x159] sm:$0xff] }
  0x87   : > { %5445 = vmatprep.mubr.msk.f32.mxu0 %vm211_vm1, %v6090_v34  ;;  %v6501_v34 = vld [vmem:[%s5941_s25 + $0x169] sm:$0xff] }
  0x89   : > { %5220 = vmatmul.mubr.msk.f32.gmra.mrb[26].mxu1 %vm211_vm1, %v6484_v28 }
  0x8a   : > { %5446 = vmatmul.mubr.msk.f32.gmra.mrb[10].mxu0 %vm211_vm1, %v6104_v36  ;;  %5222 = vmatprep.mubr.msk.f32.mxu1 %vm211_vm1, %v6487_v30  ;;  %v6512_v36 = vld [vmem:[%s5941_s25 + $0x171] sm:$0xff]  ;;  %v1023_v30 = vld [vmem:[%s5941_s25 + $0x2] sm:$0xff] }
  0x8b   : > { %5448 = vmatprep.mubr.msk.f32.mxu0 %vm211_vm1, %v6110_v38 }
  0x8d   : > { %5223 = vmatmul.mubr.msk.f32.gmra.mrb[28].mxu1 %vm211_vm1, %v6498_v32 }
  0x8e   : > { %5449 = vmatmul.mubr.msk.f32.gmra.mrb[12].mxu0 %vm211_vm1, %v6124_v40  ;;  %5225 = vmatprep.mubr.msk.f32.mxu1 %vm211_vm1, %v6501_v34  ;;  %v1024_v40 = vld [vmem:[%s5941_s25 + $0xa] sm:$0xff] }
  0x8f   : > { %5451 = vmatprep.mubr.msk.f32.mxu0 %vm211_vm1, %v6130_v42 }
  0x91   : > { %5226 = vmatmul.mubr.msk.f32.gmra.mrb[30].mxu1 %vm211_vm1, %v6512_v36 }
  0x92   : > { %5452 = vmatmul.mubr.msk.f32.gmra.mrb[14].mxu0 %vm211_vm1, %v6149_v45  ;;  %5230 = vmatprep.mubr.msk.f32.mxu1 %vm211_vm1, %v1023_v30  ;;  %v6567_v30 = vld [vmem:[%s5941_s25 + $0x180] sm:$0xff] }
  0x93   : > { %5454 = vmatprep.mubr.msk.f32.mxu0 %vm211_vm1, %v6157_v47  ;;  %7024 = vst [vmem:[#allocation37_spill] sm:$0xff] %v6567_v30 }
  0x95   : > { %5231 = vmatmul.mubr.msk.f32.vlgmr.msra.gmra.mrb[0].mxu1 %vm211_vm1, %v1024_v40  ;;  %v6578_v40 = vld [vmem:[%s5941_s25 + $0x188] sm:$0xff] }
  0x96   : > { %5455 = vmatmul.mubr.msk.f32.gmra.mrb[16].mxu0 %vm211_vm1, %v6173_v49  ;;  %5279 = vmatpush3.msk.msra.mxu1 %vm308_vm0, %v6299_v60  ;;  %v7026_v60 = vld [vmem:[#allocation18_spill] sm:$0xff] }
  0x97   : > { %5233 = vmatprep.mubr.msk.f32.mxu1 %vm211_vm1, %v6113_v39  ;;  %5457 = vmatprep.mubr.msk.f32.mxu0 %vm211_vm1, %v6179_v51  ;;  %v7025_v39 = vld [vmem:[#allocation17_spill] sm:$0xff] }
  0x98   : > { %5578 = vmatprep.subr.msk.mxu1 %vm308_vm0, %v5919_v1 }
  0x99   : > { %5234 = vmatmul.mubr.msk.f32.gmra.mrb[2].mxu1 %vm211_vm1, %v6127_v41  ;;  %v4660_v41 = vld [vmem:[%s5941_s25 + $0x198] sm:$0xff] }
  0x9a   : > { %5458 = vmatmul.mubr.msk.f32.gmra.mrb[18].mxu0 %vm211_vm1, %v6193_v53  ;;  %5236 = vmatprep.mubr.msk.f32.mxu1 %vm211_vm1, %v6133_v43 }
  0x9b   : > { %5460 = vmatprep.mubr.msk.f32.mxu0 %vm211_vm1, %v6199_v55 }
  0x9d   : > { %5237 = vmatmul.mubr.msk.f32.gmra.mrb[4].mxu1 %vm211_vm1, %v6152_v46 }
  0x9e   : > { %5461 = vmatmul.mubr.msk.f32.gmra.mrb[20].mxu0 %vm211_vm1, %v6213_v57  ;;  %5239 = vmatprep.mubr.msk.f32.mxu1 %vm211_vm1, %v6160_v48 }
  0x9f   : > { %5463 = vmatprep.mubr.msk.f32.mxu0 %vm211_vm1, %v6219_v59 }
  0xa1   : > { %5240 = vmatmul.mubr.msk.f32.gmra.mrb[6].mxu1 %vm211_vm1, %v6176_v50 }
  0xa2   : > { %5464 = vmatmul.mubr.msk.f32.gmra.mrb[22].mxu0 %vm211_vm1, %v6233_v61  ;;  %5242 = vmatprep.mubr.msk.f32.mxu1 %vm211_vm1, %v6182_v52 }
  0xa3   : > { %5466 = vmatprep.mubr.msk.f32.mxu0 %vm211_vm1, %v6239_v63 }
  0xa5   : > { %5243 = vmatmul.mubr.msk.f32.gmra.mrb[8].mxu1 %vm211_vm1, %v6196_v54 }
  0xa6   : > { %5467 = vmatmul.mubr.msk.f32.gmra.mrb[24].mxu0 %vm211_vm1, %v6253_v2  ;;  %5245 = vmatprep.mubr.msk.f32.mxu1 %vm211_vm1, %v6202_v56  ;;  %v7028_v2 = vld [vmem:[#allocation21_spill] sm:$0xff] }
  0xa7   : > { %5469 = vmatprep.mubr.msk.f32.mxu0 %vm211_vm1, %v6259_v4  ;;  %v7027_v4 = vld [vmem:[#allocation19_spill] sm:$0xff] }
  0xa9   : > { %5246 = vmatmul.mubr.msk.f32.gmra.mrb[10].mxu1 %vm211_vm1, %v6216_v58 }
  0xaa   : > { %5470 = vmatmul.mubr.msk.f32.gmra.mrb[26].mxu0 %vm211_vm1, %v6273_v10  ;;  %5248 = vmatprep.mubr.msk.f32.mxu1 %vm211_vm1, %v7025_v39  ;;  %v4661_v10 = vld [vmem:[%s5941_s25 + $0x1a0] sm:$0xff] }
  0xab   : > { %5472 = vmatprep.mubr.msk.f32.mxu0 %vm211_vm1, %v6567_v30  ;;  %v7029_v30 = vld [vmem:[#allocation23_spill] sm:$0xff] }
  0xad   : > { %5249 = vmatmul.mubr.msk.f32.gmra.mrb[12].mxu1 %vm211_vm1, %v7026_v60 }
  0xae   : > { %5473 = vmatmul.mubr.msk.f32.gmra.mrb[28].mxu0 %vm211_vm1, %v6578_v40  ;;  %5251 = vmatprep.mubr.msk.f32.mxu1 %vm211_vm1, %v7027_v4 }
  0xaf   : > { %5475 = vmatprep.mubr.msk.f32.mxu0 %vm211_vm1, %v4660_v41  ;;  %v7030_v41 = vld [vmem:[#allocation25_spill] sm:$0xff] }
  0xb1   : > { %5252 = vmatmul.mubr.msk.f32.gmra.mrb[14].mxu1 %vm211_vm1, %v7028_v2 }
  0xb2   : > { %5476 = vmatmul.mubr.msk.f32.gmra.mrb[30].mxu0 %vm211_vm1, %v4661_v10  ;;  %5254 = vmatprep.mubr.msk.f32.mxu1 %vm211_vm1, %v7029_v30  ;;  %v7047_v10 = vld [vmem:[#allocation36_spill] sm:$0xff] }
  0xb3   : > { %5480 = vmatprep.mubr.msk.f32.mxu0 %vm211_vm1, %v5958_v9  ;;  %v7031_v9 = vld [vmem:[#allocation26_spill] sm:$0xff] }
  0xb5   : > { %5255 = vmatmul.mubr.msk.f32.gmra.mrb[16].mxu1 %vm211_vm1, %v6276_v12 }
  0xb6   : > { %5481 = vmatmul.mubr.msk.f32.vlgmr.msra.gmra.mrb[0].mxu0 %vm211_vm1, %v5979_v13  ;;  %5257 = vmatprep.mubr.msk.f32.mxu1 %vm211_vm1, %v7030_v41  ;;  %v7032_v13 = vld [vmem:[#allocation27_spill] sm:$0xff] }
  0xb7   : > { %5529 = vmatpush3.msk.msra.mxu0 %vm308_vm0, %v6413_v11  ;;  %5483 = vmatprep.mubr.msk.f32.mxu0 %vm211_vm1, %v5989_v15  ;;  %v7033_v15 = vld [vmem:[#allocation28_spill] sm:$0xff]  ;;  %v7048_v11 = vld [vmem:[#allocation11_spill] sm:$0xff] }
  0xb9   : > { %5258 = vmatmul.mubr.msk.f32.gmra.mrb[18].mxu1 %vm211_vm1, %v6291_v3 }
  0xba   : > { %5484 = vmatmul.mubr.msk.f32.gmra.mrb[2].mxu0 %vm211_vm1, %v6007_v17  ;;  %5260 = vmatprep.mubr.msk.f32.mxu1 %vm211_vm1, %v6294_v62  ;;  %v7034_v17 = vld [vmem:[#allocation29_spill] sm:$0xff] }
  0xbb   : > { %5486 = vmatprep.mubr.msk.f32.mxu0 %vm211_vm1, %v6013_v19  ;;  %v7035_v19 = vld [vmem:[#allocation30_spill] sm:$0xff] }
  0xbd   : > { %5261 = vmatmul.mubr.msk.f32.gmra.mrb[20].mxu1 %vm211_vm1, %v6309_v8 }
  0xbe   : > { %5487 = vmatmul.mubr.msk.f32.gmra.mrb[4].mxu0 %vm211_vm1, %v6027_v21  ;;  %5263 = vmatprep.mubr.msk.f32.mxu1 %vm211_vm1, %v6314_v0  ;;  %v7036_v21 = vld [vmem:[#allocation31_spill] sm:$0xff] }
  0xbf   : > { %5489 = vmatprep.mubr.msk.f32.mxu0 %vm211_vm1, %v6033_v23  ;;  %v7037_v23 = vld [vmem:[#allocation32_spill] sm:$0xff] }
  0xc1   : > { %5264 = vmatmul.mubr.msk.f32.gmra.mrb[22].mxu1 %vm211_vm1, %v7031_v9 }
  0xc2   : > { %5490 = vmatmul.mubr.msk.f32.gmra.mrb[6].mxu0 %vm211_vm1, %v6047_v25  ;;  %5266 = vmatprep.mubr.msk.f32.mxu1 %vm211_vm1, %v7032_v13  ;;  %v7038_v25 = vld [vmem:[#allocation33_spill] sm:$0xff] }
  0xc3   : > { %5492 = vmatprep.mubr.msk.f32.mxu0 %vm211_vm1, %v6053_v27  ;;  %v7039_v27 = vld [vmem:[#allocation3_spill] sm:$0xff] }
  0xc5   : > { %5267 = vmatmul.mubr.msk.f32.gmra.mrb[24].mxu1 %vm211_vm1, %v7033_v15 }
  0xc6   : > { %5493 = vmatmul.mubr.msk.f32.gmra.mrb[8].mxu0 %vm211_vm1, %v6067_v29  ;;  %5269 = vmatprep.mubr.msk.f32.mxu1 %vm211_vm1, %v7034_v17  ;;  %v7040_v29 = vld [vmem:[#allocation4_spill] sm:$0xff] }
  0xc7   : > { %5495 = vmatprep.mubr.msk.f32.mxu0 %vm211_vm1, %v6073_v31  ;;  %v7041_v31 = vld [vmem:[#allocation5_spill] sm:$0xff] }
  0xc9   : > { %5270 = vmatmul.mubr.msk.f32.gmra.mrb[26].mxu1 %vm211_vm1, %v7035_v19 }
  0xca   : > { %5496 = vmatmul.mubr.msk.f32.gmra.mrb[10].mxu0 %vm211_vm1, %v6087_v33  ;;  %5272 = vmatprep.mubr.msk.f32.mxu1 %vm211_vm1, %v7036_v21  ;;  %v7042_v33 = vld [vmem:[#allocation6_spill] sm:$0xff] }
  0xcb   : > { %5498 = vmatprep.mubr.msk.f32.mxu0 %vm211_vm1, %v6093_v35  ;;  %v7044_v35 = vld [vmem:[#allocation8_spill] sm:$0xff] }
  0xcd   : > { %5273 = vmatmul.mubr.msk.f32.gmra.mrb[28].mxu1 %vm211_vm1, %v7037_v23 }
  0xce   : > { %5499 = vmatmul.mubr.msk.f32.gmra.mrb[12].mxu0 %vm211_vm1, %v6107_v37  ;;  %5275 = vmatprep.mubr.msk.f32.mxu1 %vm211_vm1, %v6372_v6  ;;  %v7046_v37 = vld [vmem:[#allocation10_spill] sm:$0xff] }
  0xcf   : > { %5501 = vmatprep.mubr.msk.f32.mxu0 %vm211_vm1, %v6408_v5 }
  0xd1   : > { %5276 = vmatmul.mubr.msk.f32.gmra.mrb[30].mxu1 %vm211_vm1, %v7038_v25 }
  0xd2   : > { %5502 = vmatmul.mubr.msk.f32.gmra.mrb[14].mxu0 %vm211_vm1, %v6424_v7  ;;  %5280 = vmatprep.mubr.msk.f32.mxu1 %vm211_vm1, %v7039_v27  ;;  %v7049_v27 = vld [vmem:[#allocation12_spill] sm:$0xff] }
  0xd3   : > { %5504 = vmatprep.mubr.msk.f32.mxu0 %vm211_vm1, %v6429_v14 }
  0xd5   : > { %5281 = vmatmul.mubr.msk.f32.vlgmr.msra.gmra.mrb[0].mxu1 %vm211_vm1, %v7040_v29  ;;  %v6705_v29 = vld [vmem:[%s5941_s25 + $0x181] sm:$0xff] }
  0xd6   : > { %5505 = vmatmul.mubr.msk.f32.gmra.mrb[16].mxu0 %vm211_vm1, %v6442_v44  ;;  %5579 = vmatpush3.msk.msra.mxu1 %vm308_vm0, %v5919_v1  ;;  %v7043_v1 = vld [vmem:[#allocation7_spill] sm:$0xff] }
  0xd7   : > { %5283 = vmatprep.mubr.msk.f32.mxu1 %vm211_vm1, %v7041_v31  ;;  %5507 = vmatprep.mubr.msk.f32.mxu0 %vm211_vm1, %v6445_v18  ;;  %v7050_v31 = vld [vmem:[#allocation13_spill] sm:$0xff] }
  0xd9   : > { %5284 = vmatmul.mubr.msk.f32.gmra.mrb[2].mxu1 %vm211_vm1, %v6004_v16  ;;  %v7045_v16 = vld [vmem:[#allocation9_spill] sm:$0xff] }
  0xda   : > { %5508 = vmatmul.mubr.msk.f32.gmra.mrb[18].mxu0 %vm211_vm1, %v6456_v20  ;;  %5286 = vmatprep.mubr.msk.f32.mxu1 %vm211_vm1, %v7042_v33  ;;  %v7051_v33 = vld [vmem:[#allocation14_spill] sm:$0xff] }
  0xdb   : > { %5510 = vmatprep.mubr.msk.f32.mxu0 %vm211_vm1, %v6459_v22 }
  0xdd   : > { %5287 = vmatmul.mubr.msk.f32.gmra.mrb[4].mxu1 %vm211_vm1, %v7043_v1  ;;  %v6716_v1 = vld [vmem:[%s5941_s25 + $0x189] sm:$0xff] }
  0xde   : > { %5511 = vmatmul.mubr.msk.f32.gmra.mrb[20].mxu0 %vm211_vm1, %v6470_v24  ;;  %5289 = vmatprep.mubr.msk.f32.mxu1 %vm211_vm1, %v7044_v35  ;;  %v4726_v35 = vld [vmem:[%s5941_s25 + $0x199] sm:$0xff] }
  0xdf   : > { %5513 = vmatprep.mubr.msk.f32.mxu0 %vm211_vm1, %v6473_v26 }
  0xe1   : > { %5290 = vmatmul.mubr.msk.f32.gmra.mrb[6].mxu1 %vm211_vm1, %v7045_v16  ;;  %v7052_v16 = vld [vmem:[#allocation15_spill] sm:$0xff] }
  0xe2   : > { %5514 = vmatmul.mubr.msk.f32.gmra.mrb[22].mxu0 %vm211_vm1, %v6484_v28  ;;  %5292 = vmatprep.mubr.msk.f32.mxu1 %vm211_vm1, %v7046_v37  ;;  %v4727_v37 = vld [vmem:[%s5941_s25 + $0x1a1] sm:$0xff] }
  0xe3   : > { %5516 = vmatprep.mubr.msk.f32.mxu0 %vm211_vm1, %v7047_v10 }
  0xe5   : > { %5293 = vmatmul.mubr.msk.f32.gmra.mrb[8].mxu1 %vm211_vm1, %v7048_v11  ;;  %v7053_v11 = vld [vmem:[#allocation16_spill] sm:$0xff] }
  0xe6   : > { %5517 = vmatmul.mubr.msk.f32.gmra.mrb[24].mxu0 %vm211_vm1, %v6498_v32  ;;  %5295 = vmatprep.mubr.msk.f32.mxu1 %vm211_vm1, %v7049_v27 }
  0xe7   : > { %5519 = vmatprep.mubr.msk.f32.mxu0 %vm211_vm1, %v6501_v34 }
  0xe9   : > { %5296 = vmatmul.mubr.msk.f32.gmra.mrb[10].mxu1 %vm211_vm1, %v7050_v31 }
  0xea   : > { %5520 = vmatmul.mubr.msk.f32.gmra.mrb[26].mxu0 %vm211_vm1, %v6512_v36  ;;  %5298 = vmatprep.mubr.msk.f32.mxu1 %vm211_vm1, %v7051_v33 }
  0xeb   : > { %5522 = vmatprep.mubr.msk.f32.mxu0 %vm211_vm1, %v6705_v29 }
  0xed   : > { %5299 = vmatmul.mubr.msk.f32.gmra.mrb[12].mxu1 %vm211_vm1, %v7052_v16 }
  0xee   : > { %5523 = vmatmul.mubr.msk.f32.gmra.mrb[28].mxu0 %vm211_vm1, %v6716_v1  ;;  %5301 = vmatprep.mubr.msk.f32.mxu1 %vm211_vm1, %v6110_v38  ;;  %v7054_v38 = vld [vmem:[#allocation20_spill] sm:$0xff] }
  0xef   : > { %5525 = vmatprep.mubr.msk.f32.mxu0 %vm211_vm1, %v4726_v35 }
  0xf1   : > { %5302 = vmatmul.mubr.msk.f32.gmra.mrb[14].mxu1 %vm211_vm1, %v7053_v11 }
  0xf2   : > { %5526 = vmatmul.mubr.msk.f32.gmra.mrb[30].mxu0 %vm211_vm1, %v4727_v37  ;;  %5304 = vmatprep.mubr.msk.f32.mxu1 %vm211_vm1, %v6130_v42  ;;  %v7055_v42 = vld [vmem:[#allocation22_spill] sm:$0xff] }
  0xf3   : > { %5530 = vmatprep.mubr.msk.f32.mxu0 %vm211_vm1, %v6133_v43  ;;  %v7056_v43 = vld [vmem:[#allocation24_spill] sm:$0xff] }
  0xf5   : > { %5305 = vmatmul.mubr.msk.f32.gmra.mrb[16].mxu1 %vm211_vm1, %v6149_v45  ;;  %v7057_v45 = vld [vmem:[#allocation37_spill] sm:$0xff] }
  0xf6   : > { %5531 = vmatmul.mubr.msk.f32.vlgmr.msra.gmra.mrb[0].mxu0 %vm211_vm1, %v6152_v46  ;;  %5307 = vmatprep.mubr.msk.f32.mxu1 %vm211_vm1, %v6157_v47 }
  0xf7   : > { %5533 = vmatprep.mubr.msk.f32.mxu0 %vm211_vm1, %v6160_v48 }
  0xf9   : > { %5308 = vmatmul.mubr.msk.f32.gmra.mrb[18].mxu1 %vm211_vm1, %v6173_v49 }
  0xfa   : > { %5534 = vmatmul.mubr.msk.f32.gmra.mrb[2].mxu0 %vm211_vm1, %v6176_v50  ;;  %5310 = vmatprep.mubr.msk.f32.mxu1 %vm211_vm1, %v6179_v51 }
  0xfb   : > { %5536 = vmatprep.mubr.msk.f32.mxu0 %vm211_vm1, %v6182_v52 }
  0xfd   : > { %5311 = vmatmul.mubr.msk.f32.gmra.mrb[20].mxu1 %vm211_vm1, %v6193_v53  ;;  %v6861_v53 = vld [vmem:[%s6938_s2] ss:$0 sm:$0xff] }
  0xfe   : > { %5537 = vmatmul.mubr.msk.f32.gmra.mrb[4].mxu0 %vm211_vm1, %v6196_v54  ;;  %5313 = vmatprep.mubr.msk.f32.mxu1 %vm211_vm1, %v6199_v55 }
  0xff   : > { %5539 = vmatprep.mubr.msk.f32.mxu0 %vm211_vm1, %v6202_v56 }
 0x101   : > { %5314 = vmatmul.mubr.msk.f32.gmra.mrb[22].mxu1 %vm211_vm1, %v6213_v57 }
 0x102   : > { %5540 = vmatmul.mubr.msk.f32.gmra.mrb[6].mxu0 %vm211_vm1, %v6216_v58  ;;  %5316 = vmatprep.mubr.msk.f32.mxu1 %vm211_vm1, %v6219_v59 }
 0x103   : > { %5542 = vmatprep.mubr.msk.f32.mxu0 %vm211_vm1, %v7025_v39 }
 0x105   : > { %5317 = vmatmul.mubr.msk.f32.gmra.mrb[24].mxu1 %vm211_vm1, %v6233_v61 }
 0x106   : > { %5543 = vmatmul.mubr.msk.f32.gmra.mrb[8].mxu0 %vm211_vm1, %v7026_v60  ;;  %5319 = vmatprep.mubr.msk.f32.mxu1 %vm211_vm1, %v6239_v63 }
 0x107   : > { %5545 = vmatprep.mubr.msk.f32.mxu0 %vm211_vm1, %v7027_v4 }
 0x109   : > { %5320 = vmatmul.mubr.msk.f32.gmra.mrb[26].mxu1 %vm211_vm1, %v7054_v38 }
 0x10a   : > { %5546 = vmatmul.mubr.msk.f32.gmra.mrb[10].mxu0 %vm211_vm1, %v7028_v2  ;;  %5322 = vmatprep.mubr.msk.f32.mxu1 %vm211_vm1, %v7055_v42 }
 0x10b   : > { %5548 = vmatprep.mubr.msk.f32.mxu0 %vm211_vm1, %v7029_v30 }
 0x10d   : > { %5323 = vmatmul.mubr.msk.f32.gmra.mrb[28].mxu1 %vm211_vm1, %v7056_v43 }
 0x10e   : > { %5549 = vmatmul.mubr.msk.f32.gmra.mrb[12].mxu0 %vm211_vm1, %v6276_v12  ;;  %5325 = vmatprep.mubr.msk.f32.mxu1 %vm211_vm1, %v7057_v45  ;;  %v7058_v12 = vld [vmem:[#allocation34_spill] sm:$0xff] }
 0x10f   : > { %5551 = vmatprep.mubr.msk.f32.mxu0 %vm211_vm1, %v7030_v41 }
 0x111   : > { %5326 = vmatmul.mubr.msk.f32.gmra.mrb[30].mxu1 %vm211_vm1, %v6578_v40 }
 0x112   : > { %5552 = vmatmul.mubr.msk.f32.gmra.mrb[14].mxu0 %vm211_vm1, %v6291_v3  ;;  %5354 = vmatprep.mubr.msk.f32.mxu1 %vm211_vm1, %v6408_v5 }
 0x113   : > { %5554 = vmatprep.mubr.msk.f32.mxu0 %vm211_vm1, %v6294_v62 }
 0x115   : > { %5355 = vmatmul.mubr.msk.f32.vlgmr.msra.gmra.mrb[16].mxu1 %vm211_vm1, %v6424_v7 }
 0x116   : > { %5555 = vmatmul.mubr.msk.f32.gmra.mrb[16].mxu0 %vm211_vm1, %v6309_v8  ;;  %5357 = vmatprep.mubr.msk.f32.mxu1 %vm211_vm1, %v6429_v14  ;;  %v4792_v14 = vld [vmem:[%s5941_s25 + $0x19a] sm:$0xff] }
 0x117   : > { %5557 = vmatprep.mubr.msk.f32.mxu0 %vm211_vm1, %v6314_v0 }
 0x119   : > { %5358 = vmatmul.mubr.msk.f32.gmra.mrb[18].mxu1 %vm211_vm1, %v6442_v44 }
 0x11a   : > { %5558 = vmatmul.mubr.msk.f32.gmra.mrb[18].mxu0 %vm211_vm1, %v7031_v9  ;;  %5360 = vmatprep.mubr.msk.f32.mxu1 %vm211_vm1, %v6445_v18  ;;  %v7059_v18 = vld [vmem:[#allocation35_spill] sm:$0xff] }
 0x11b   : > { %5560 = vmatprep.mubr.msk.f32.mxu0 %vm211_vm1, %v7032_v13 }
 0x11d   : > { %5361 = vmatmul.mubr.msk.f32.gmra.mrb[20].mxu1 %vm211_vm1, %v6456_v20  ;;  %v4793_v20 = vld [vmem:[%s5941_s25 + $0x1a2] sm:$0xff] }
 0x11e   : > { %5561 = vmatmul.mubr.msk.f32.gmra.mrb[20].mxu0 %vm211_vm1, %v7033_v15  ;;  %5363 = vmatprep.mubr.msk.f32.mxu1 %vm211_vm1, %v6459_v22 }
 0x11f   : > { %5563 = vmatprep.mubr.msk.f32.mxu0 %vm211_vm1, %v7034_v17 }
 0x121   : > { %5364 = vmatmul.mubr.msk.f32.gmra.mrb[22].mxu1 %vm211_vm1, %v6470_v24 }
 0x122   : > { %5564 = vmatmul.mubr.msk.f32.gmra.mrb[22].mxu0 %vm211_vm1, %v7035_v19  ;;  %5366 = vmatprep.mubr.msk.f32.mxu1 %vm211_vm1, %v6473_v26 }
 0x123   : > { %5566 = vmatprep.mubr.msk.f32.mxu0 %vm211_vm1, %v7036_v21 }
 0x125   : > { %5367 = vmatmul.mubr.msk.f32.gmra.mrb[24].mxu1 %vm211_vm1, %v6484_v28 }
 0x126   : > { %5567 = vmatmul.mubr.msk.f32.gmra.mrb[24].mxu0 %vm211_vm1, %v7037_v23  ;;  %5369 = vmatprep.mubr.msk.f32.mxu1 %vm211_vm1, %v7047_v10 }
 0x127   : > { %5569 = vmatprep.mubr.msk.f32.mxu0 %vm211_vm1, %v6372_v6 }
 0x129   : > { %5370 = vmatmul.mubr.msk.f32.gmra.mrb[26].mxu1 %vm211_vm1, %v6498_v32 }
 0x12a   : > { %5570 = vmatmul.mubr.msk.f32.gmra.mrb[26].mxu0 %vm211_vm1, %v7038_v25  ;;  %5372 = vmatprep.mubr.msk.f32.mxu1 %vm211_vm1, %v6501_v34 }
 0x12b   : > { %5572 = vmatprep.mubr.msk.f32.mxu0 %vm211_vm1, %v7058_v12 }
 0x12d   : > { %5373 = vmatmul.mubr.msk.f32.gmra.mrb[28].mxu1 %vm211_vm1, %v6512_v36 }
 0x12e   : > { %5573 = vmatmul.mubr.msk.f32.gmra.mrb[28].mxu0 %vm211_vm1, %v7059_v18  ;;  %5375 = vmatprep.mubr.msk.f32.mxu1 %vm211_vm1, %v6705_v29 }
 0x12f   : > { %5575 = vmatprep.mubr.msk.f32.mxu0 %vm211_vm1, %v4792_v14 }
 0x131   : > { %5376 = vmatmul.mubr.msk.f32.gmra.mrb[30].mxu1 %vm211_vm1, %v6716_v1 }
 0x132   : > { %5576 = vmatmul.mubr.msk.f32.gmra.mrb[30].mxu0 %vm211_vm1, %v4793_v20 }
 0x1a8   : > { %v5282_v22 = vpop.f32.mrb[0].mxu1 }
 0x1a9   : > { %v1677_v24 = vpop.f32.mrb[1].mxu1  ;;  %v5580_v56 = vadd.f32 %v5282_v22, %v6861_v53 }
 0x1aa   : > { %v5582_v57 = vadd.f32 %v6861_v53, %v1677_v24 }
 0x1ac   : > { %v5285_v26 = vpop.f32.mrb[2].mxu1 }
 0x1ad   : > { %v1687_v28 = vpop.f32.mrb[3].mxu1  ;;  %v5584_v63 = vadd.f32 %v5285_v26, %v6861_v53 }
 0x1ae   : > { %v5586_v0 = vadd.f32 %v6861_v53, %v1687_v28 }
 0x1b0   : > { %v5288_v32 = vpop.f32.mrb[4].mxu1 }
 0x1b1   : > { %v1697_v34 = vpop.f32.mrb[5].mxu1  ;;  %v5588_v5 = vadd.f32 %v5288_v32, %v6861_v53 }
 0x1b2   : > { %v5590_v7 = vadd.f32 %v6861_v53, %v1697_v34 }
 0x1b4   : > { %v5291_v36 = vpop.f32.mrb[6].mxu1 }
 0x1b5   : > { %v1707_v46 = vpop.f32.mrb[7].mxu1  ;;  %v5592_v40 = vadd.f32 %v5291_v36, %v6861_v53 }
 0x1b6   : > { %v5594_v60 = vadd.f32 %v6861_v53, %v1707_v46 }
 0x1b8   : > { %v5294_v47 = vpop.f32.mrb[8].mxu1 }
 0x1b9   : > { %v1717_v48 = vpop.f32.mrb[9].mxu1  ;;  %v5596_v17 = vadd.f32 %v5294_v47, %v6861_v53 }
 0x1ba   : > { %v5598_v19 = vadd.f32 %v6861_v53, %v1717_v48 }
 0x1bc   : > { %v5297_v49 = vpop.f32.mrb[10].mxu1 }
 0x1bd   : > { %v1727_v50 = vpop.f32.mrb[11].mxu1  ;;  %v5600_v27 = vadd.f32 %v5297_v49, %v6861_v53 }
 0x1be   : > { %v5602_v29 = vadd.f32 %v6861_v53, %v1727_v50 }
 0x1c0   : > { %v5300_v51 = vpop.f32.mrb[12].mxu1 }
 0x1c1   : > { %v1737_v52 = vpop.f32.mrb[13].mxu1  ;;  %v5604_v16 = vadd.f32 %v5300_v51, %v6861_v53 }
 0x1c2   : > { %v5606_v37 = vadd.f32 %v6861_v53, %v1737_v52 }
 0x1c4   : > { %v5303_v54 = vpop.f32.mrb[14].mxu1 }
 0x1c5   : > { %v1747_v55 = vpop.f32.mrb[15].mxu1  ;;  %v5608_v45 = vadd.f32 %v5303_v54, %v6861_v53 }
 0x1c6   : > { %v5610_v12 = vadd.f32 %v6861_v53, %v1747_v55 }
 0x1c9   : > { %v5532_v58 = vpop.f32.mrb[0].mxu0 }
 0x1ca   : > { %v5581_v59 = vadd.f32 %v5580_v56, %v5532_v58  ;;  %v3948_v61 = vpop.f32.mrb[1].mxu0 }
 0x1cb   : > { %v5583_v62 = vadd.f32 %v5582_v57, %v3948_v61 }
 0x1cc   : > { %4236 = vst [vmem:[%s6869_s16 + $0x8] sm:$0xff] %v5581_v59 }
 0x1cd   : > { %4235 = vst [vmem:[%s6869_s16] sm:$0xff] %v5583_v62  ;;  %v5535_v2 = vpop.f32.mrb[2].mxu0 }
 0x1ce   : > { %v5585_v3 = vadd.f32 %v5584_v63, %v5535_v2  ;;  %v3958_v4 = vpop.f32.mrb[3].mxu0 }
 0x1cf   : > { %v5587_v8 = vadd.f32 %v5586_v0, %v3958_v4 }
 0x1d0   : > { %4238 = vst [vmem:[%s6869_s16 + $0x18] sm:$0xff] %v5585_v3 }
 0x1d1   : > { %4237 = vst [vmem:[%s6869_s16 + $0x10] sm:$0xff] %v5587_v8  ;;  %v5538_v6 = vpop.f32.mrb[4].mxu0 }
 0x1d2   : > { %v5589_v44 = vadd.f32 %v5588_v5, %v5538_v6  ;;  %v3968_v30 = vpop.f32.mrb[5].mxu0 }
 0x1d3   : > { %v5591_v39 = vadd.f32 %v5590_v7, %v3968_v30 }
 0x1d4   : > { %4240 = vst [vmem:[%s6869_s16 + $0x28] sm:$0xff] %v5589_v44 }
 0x1d5   : > { %4239 = vst [vmem:[%s6869_s16 + $0x20] sm:$0xff] %v5591_v39  ;;  %v5541_v41 = vpop.f32.mrb[6].mxu0 }
 0x1d6   : > { %v5593_v9 = vadd.f32 %v5592_v40, %v5541_v41  ;;  %v3978_v13 = vpop.f32.mrb[7].mxu0 }
 0x1d7   : > { %v5595_v15 = vadd.f32 %v5594_v60, %v3978_v13 }
 0x1d8   : > { %4242 = vst [vmem:[%s6869_s16 + $0x38] sm:$0xff] %v5593_v9 }
 0x1d9   : > { %4241 = vst [vmem:[%s6869_s16 + $0x30] sm:$0xff] %v5595_v15  ;;  %v5544_v21 = vpop.f32.mrb[8].mxu0 }
 0x1da   : > { %v5597_v23 = vadd.f32 %v5596_v17, %v5544_v21  ;;  %v3988_v25 = vpop.f32.mrb[9].mxu0 }
 0x1db   : > { %v5599_v10 = vadd.f32 %v5598_v19, %v3988_v25 }
 0x1dc   : > { %4244 = vst [vmem:[%s6869_s16 + $0x48] sm:$0xff] %v5597_v23 }
 0x1dd   : > { %4243 = vst [vmem:[%s6869_s16 + $0x40] sm:$0xff] %v5599_v10  ;;  %v5547_v31 = vpop.f32.mrb[10].mxu0 }
 0x1de   : > { %v5601_v33 = vadd.f32 %v5600_v27, %v5547_v31  ;;  %v3998_v1 = vpop.f32.mrb[11].mxu0 }
 0x1df   : > { %v5603_v35 = vadd.f32 %v5602_v29, %v3998_v1 }
 0x1e0   : > { %4246 = vst [vmem:[%s6869_s16 + $0x58] sm:$0xff] %v5601_v33 }
 0x1e1   : > { %4245 = vst [vmem:[%s6869_s16 + $0x50] sm:$0xff] %v5603_v35  ;;  %v5550_v11 = vpop.f32.mrb[12].mxu0 }
 0x1e2   : > { %v5605_v38 = vadd.f32 %v5604_v16, %v5550_v11  ;;  %v4008_v42 = vpop.f32.mrb[13].mxu0 }
 0x1e3   : > { %v5607_v43 = vadd.f32 %v5606_v37, %v4008_v42 }
 0x1e4   : > { %4248 = vst [vmem:[%s6869_s16 + $0x68] sm:$0xff] %v5605_v38 }
 0x1e5   : > { %4247 = vst [vmem:[%s6869_s16 + $0x60] sm:$0xff] %v5607_v43  ;;  %v5553_v14 = vpop.f32.mrb[14].mxu0 }
 0x1e6   : > { %v5609_v18 = vadd.f32 %v5608_v45, %v5553_v14  ;;  %v4018_v20 = vpop.f32.mrb[15].mxu0 }
 0x1e7   : > { %v5611_v22 = vadd.f32 %v5610_v12, %v4018_v20 }
 0x1e8   : > { %4250 = vst [vmem:[%s6869_s16 + $0x78] sm:$0xff] %v5609_v18  ;;  %v5356_v24 = vpop.f32.mrb[16].mxu1 }
 0x1e9   : > { %4249 = vst [vmem:[%s6869_s16 + $0x70] sm:$0xff] %v5611_v22  ;;  %v5556_v26 = vpop.f32.mrb[16].mxu0  ;;  %v5612_v28 = vadd.f32 %v5356_v24, %v6861_v53  ;;  %v2211_v32 = vpop.f32.mrb[17].mxu1 }
 0x1ea   : > { %v4028_v34 = vpop.f32.mrb[17].mxu0  ;;  %v5614_v36 = vadd.f32 %v6861_v53, %v2211_v32 }
 0x1eb   : > { %v5613_v46 = vadd.f32 %v5612_v28, %v5556_v26 }
 0x1ec   : > { %v5615_v47 = vadd.f32 %v5614_v36, %v4028_v34  ;;  %v5359_v48 = vpop.f32.mrb[18].mxu1 }
 0x1ed   : > { %v5559_v49 = vpop.f32.mrb[18].mxu0  ;;  %4252 = vst [vmem:[%s6869_s16 + $0x88] sm:$0xff] %v5613_v46  ;;  %v5616_v50 = vadd.f32 %v5359_v48, %v6861_v53  ;;  %v2221_v51 = vpop.f32.mrb[19].mxu1 }
 0x1ee   : > { %v4038_v52 = vpop.f32.mrb[19].mxu0  ;;  %4251 = vst [vmem:[%s6869_s16 + $0x80] sm:$0xff] %v5615_v47  ;;  %v5618_v54 = vadd.f32 %v6861_v53, %v2221_v51 }
 0x1ef   : > { %v5617_v55 = vadd.f32 %v5616_v50, %v5559_v49 }
 0x1f0   : > { %v5619_v56 = vadd.f32 %v5618_v54, %v4038_v52  ;;  %v5362_v57 = vpop.f32.mrb[20].mxu1 }
 0x1f1   : > { %v5562_v58 = vpop.f32.mrb[20].mxu0  ;;  %4254 = vst [vmem:[%s6869_s16 + $0x98] sm:$0xff] %v5617_v55  ;;  %v5620_v59 = vadd.f32 %v5362_v57, %v6861_v53  ;;  %v2231_v61 = vpop.f32.mrb[21].mxu1 }
 0x1f2   : > { %v4048_v62 = vpop.f32.mrb[21].mxu0  ;;  %4253 = vst [vmem:[%s6869_s16 + $0x90] sm:$0xff] %v5619_v56  ;;  %v5622_v63 = vadd.f32 %v6861_v53, %v2231_v61 }
 0x1f3   : > { %v5621_v0 = vadd.f32 %v5620_v59, %v5562_v58 }
 0x1f4   : > { %v5623_v2 = vadd.f32 %v5622_v63, %v4048_v62  ;;  %v5365_v3 = vpop.f32.mrb[22].mxu1 }
 0x1f5   : > { %v5565_v4 = vpop.f32.mrb[22].mxu0  ;;  %4256 = vst [vmem:[%s6869_s16 + $0xa8] sm:$0xff] %v5621_v0  ;;  %v5624_v8 = vadd.f32 %v5365_v3, %v6861_v53  ;;  %v2241_v5 = vpop.f32.mrb[23].mxu1 }
 0x1f6   : > { %v4058_v7 = vpop.f32.mrb[23].mxu0  ;;  %4255 = vst [vmem:[%s6869_s16 + $0xa0] sm:$0xff] %v5623_v2  ;;  %v5626_v6 = vadd.f32 %v6861_v53, %v2241_v5 }
 0x1f7   : > { %v5625_v44 = vadd.f32 %v5624_v8, %v5565_v4 }
 0x1f8   : > { %v5627_v30 = vadd.f32 %v5626_v6, %v4058_v7  ;;  %v5368_v39 = vpop.f32.mrb[24].mxu1 }
 0x1f9   : > { %v5568_v40 = vpop.f32.mrb[24].mxu0  ;;  %4258 = vst [vmem:[%s6869_s16 + $0xb8] sm:$0xff] %v5625_v44  ;;  %v5628_v60 = vadd.f32 %v5368_v39, %v6861_v53  ;;  %v2251_v41 = vpop.f32.mrb[25].mxu1 }
 0x1fa   : > { %v4068_v9 = vpop.f32.mrb[25].mxu0  ;;  %4257 = vst [vmem:[%s6869_s16 + $0xb0] sm:$0xff] %v5627_v30  ;;  %v5630_v13 = vadd.f32 %v6861_v53, %v2251_v41 }
 0x1fb   : > { %v5629_v15 = vadd.f32 %v5628_v60, %v5568_v40 }
 0x1fc   : > { %v5631_v17 = vadd.f32 %v5630_v13, %v4068_v9  ;;  %v5371_v19 = vpop.f32.mrb[26].mxu1 }
 0x1fd   : > { %v5571_v21 = vpop.f32.mrb[26].mxu0  ;;  %4260 = vst [vmem:[%s6869_s16 + $0xc8] sm:$0xff] %v5629_v15  ;;  %v5632_v23 = vadd.f32 %v5371_v19, %v6861_v53  ;;  %v2261_v25 = vpop.f32.mrb[27].mxu1 }
 0x1fe   : > { %v4078_v10 = vpop.f32.mrb[27].mxu0  ;;  %4259 = vst [vmem:[%s6869_s16 + $0xc0] sm:$0xff] %v5631_v17  ;;  %v5634_v27 = vadd.f32 %v6861_v53, %v2261_v25 }
 0x1ff   : > { %v5633_v29 = vadd.f32 %v5632_v23, %v5571_v21 }
 0x200   : > { %v5635_v31 = vadd.f32 %v5634_v27, %v4078_v10  ;;  %v5374_v33 = vpop.f32.mrb[28].mxu1 }
 0x201   : > { %v5574_v1 = vpop.f32.mrb[28].mxu0  ;;  %4262 = vst [vmem:[%s6869_s16 + $0xd8] sm:$0xff] %v5633_v29  ;;  %v5636_v35 = vadd.f32 %v5374_v33, %v6861_v53  ;;  %v2271_v16 = vpop.f32.mrb[29].mxu1 }
 0x202   : > { %v4088_v37 = vpop.f32.mrb[29].mxu0  ;;  %4261 = vst [vmem:[%s6869_s16 + $0xd0] sm:$0xff] %v5635_v31  ;;  %v5638_v11 = vadd.f32 %v6861_v53, %v2271_v16 }
 0x203   : > { %v5637_v38 = vadd.f32 %v5636_v35, %v5574_v1 }
 0x204   : > { %v5639_v42 = vadd.f32 %v5638_v11, %v4088_v37  ;;  %v5377_v43 = vpop.f32.mrb[30].mxu1 }
 0x205   : > { %v5577_v45 = vpop.f32.mrb[30].mxu0  ;;  %4264 = vst [vmem:[%s6869_s16 + $0xe8] sm:$0xff] %v5637_v38  ;;  %v5640_v12 = vadd.f32 %v5377_v43, %v6861_v53  ;;  %v2281_v14 = vpop.f32.mrb[31].mxu1 }
 0x206   : > { %v4098_v18 = vpop.f32.mrb[31].mxu0  ;;  %4263 = vst [vmem:[%s6869_s16 + $0xe0] sm:$0xff] %v5639_v42  ;;  %v5642_v20 = vadd.f32 %v6861_v53, %v2281_v14 }
 0x207   : > { %v5641_v22 = vadd.f32 %v5640_v12, %v5577_v45 }
 0x208   : > { %v5643_v24 = vadd.f32 %v5642_v20, %v4098_v18 }
 0x209   : > { %4266 = vst [vmem:[%s6869_s16 + $0xf8] sm:$0xff] %v5641_v22 }
 0x20a   : > { %4265 = vst [vmem:[%s6869_s16 + $0xf0] sm:$0xff] %v5643_v24 }
 0x20b PF: > { %s13_s12 = sadd.s32 1, %s5883_s12  }
 0x20c   : > { %p10_p4 = scmp.ge.s32.totalorder %s13_s12, 4  }
 0x20e   :  { %12 = sbr.rel (!%p10_p4) target bundleno = 1 (0x1), region = 72 }

</bundles_post_ra>
